<compile_context>
chip_gen: v6e
topology: v6e:2x2x1
jax: 0.10.0
libtpu: 0.0.40
codegen_flags: <defaults>
</compile_context>

<pallas_src>
import functools

import numpy as np

import jax
import jax.numpy as jnp
from jax.experimental import pallas as pl
from jax.experimental.pallas import tpu as pltpu  # noqa: F401  (TPU backend assumed)


# ----------------------------------------------------------------------------
# Fused Pallas kernel: CNN feature extractor + 2-layer LSTM wavefront + FC head
# ----------------------------------------------------------------------------
def lstm_cnn_fused_kernel(*refs, conv_channels, pool, hidden_size, seq_len, num_layers):
    H, T, NL = hidden_size, seq_len, num_layers
    G = 4 * H                       # gates per layer
    BW = NL * G                     # gate width per wavefront step
    NW = T + NL - 1                 # wavefront steps
    n_conv = len(conv_channels)

    x_ref = refs[0]
    conv_refs = [refs[1 + 3 * i: 4 + 3 * i] for i in range(n_conv)]
    wx_ref, bx_ref, wr_ref, wfc_ref, bfc_ref, o_ref = refs[1 + 3 * n_conv:]

    # --- CNN feature extractor: one matmul + folded BN/ReLU + shifted-max pooling per block ---
    act = x_ref[...]                                              # (B, C_in*L) flattened input
    for ci, (m_ref, s_ref, t_ref) in enumerate(conv_refs):
        C = conv_channels[ci]
        y = jnp.dot(act, m_ref[...], preferred_element_type=jnp.float32)
        y = jnp.maximum(y * s_ref[...] + t_ref[...], 0.0)         # (B, L_out*C), lane = (pos, ch)
        keep = y.shape[1] - (pool - 1) * C
        v = y[:, :keep]
        for r in range(1, pool):                                  # MaxPool1d as shifted-slice max
            v = jnp.maximum(v, y[:, r * C: r * C + keep])
        act = v                                                   # pooled, lane-uncompacted
        # Dropout(drop_prob) after each conv block is identity in eval mode.

    # --- hoisted LSTM layer-0 input path + per-layer biases for ALL wavefront steps ---
    gxb = jnp.dot(act, wx_ref[...], preferred_element_type=jnp.float32) + bx_ref[...]
    # gxb: (B, NW*NL*4H); block w = [layer-0 x-path gates @ t=w | layer-1 bias | ...]

    B = act.shape[0]
    wr = wr_ref[...]                                              # (NL*H, NL*4H) block matrix
    wr_rows = [wr[l * H:(l + 1) * H, :] for l in range(NL)]

    h = [jnp.zeros((B, H), jnp.float32) for _ in range(NL)]
    c = [jnp.zeros((B, H), jnp.float32) for _ in range(NL)]
    h_last = None
    for w in range(NW):                                           # diagonal (time, layer) wavefront
        z = gxb[:, w * BW:(w + 1) * BW]
        for l in range(NL):                                       # independent -> back-to-back MXU
            z = z + jnp.dot(h[l], wr_rows[l], preferred_element_type=jnp.float32)
        sig = jax.nn.sigmoid(z)                                   # one full-width sigmoid pass
        th = jnp.tanh(z)                                          # one full-width tanh pass
        for l in range(NL):
            t = w - l
            if 0 <= t < T:                                        # static: layer active this step
                b0 = l * G
                i_g = sig[:, b0:b0 + H]
                f_g = sig[:, b0 + H:b0 + 2 * H]
                g_g = th[:, b0 + 2 * H:b0 + 3 * H]
                o_g = sig[:, b0 + 3 * H:b0 + 4 * H]
                c[l] = f_g * c[l] + i_g * g_g
                h[l] = o_g * jnp.tanh(c[l])
                if l == NL - 1 and t == T - 1:
                    h_last = h[l]
        # inter-layer LSTM dropout(0.2) is identity in eval mode.

    # FC head on the last layer's final hidden state (== out_packed[-1]); lane-dense padded store.
    out = jnp.dot(h_last, wfc_ref[...], preferred_element_type=jnp.float32) + bfc_ref[...]
    o_ref[...] = out.astype(o_ref.dtype)


# ----------------------------------------------------------------------------
# Wrapper around the single gridless pallas_call
# ----------------------------------------------------------------------------
def lstm_cnn_forward(x, packed_args, *, meta, config):
    """x: (B, 1, num_feats, num_samples) -> (B, output_size)."""
    B = x.shape[0]
    x_flat = x[:, 0].reshape(B, -1)                               # (B, C_in*L), free layout op
    kern = functools.partial(
        lstm_cnn_fused_kernel,
        conv_channels=meta["conv_channels"], pool=meta["pool"],
        hidden_size=meta["hidden_size"], seq_len=meta["seq_len"],
        num_layers=meta["num_layers"])
    out_pad = pl.pallas_call(
        kern,
        out_shape=jax.ShapeDtypeStruct((B, meta["out_pad"]), jnp.float32),
    )(x_flat, *packed_args)
    return out_pad[:, :config["output_size"]]                     # free lane slice in XLA


# ----------------------------------------------------------------------------
# Parameter repacking (done once, outside the kernel; pure layout plumbing)
# ----------------------------------------------------------------------------
def _conv_geometry(config, num_samples):
    pool = config["pool_size"]
    pad = config["padding"]
    geo = []
    L = num_samples
    C_in = config["in_channels"]
    for i in range(config["layers"]):
        K = config["kernel_size"][i]
        s = config["strides"][i]
        C_out = config["channels"][i]
        L_out = (L + 2 * pad - K) // s + 1
        Lp = L_out // pool
        geo.append(dict(K=K, s=s, pad=pad, C_in=C_in, C_out=C_out, L_in=L, L_out=L_out, Lp=Lp))
        C_in = C_out
        L = Lp
    return geo


def pack_params(params, config, num_samples):
    pool = config["pool_size"]
    H = config["hidden_size"]
    NL = config["num_layers"]
    O = config["output_size"]
    G = 4 * H
    geo = _conv_geometry(config, num_samples)

    args = []
    prev_keep = None
    for i, g in enumerate(geo):
        w = np.asarray(params["conv"][i]["w"], np.float32)        # (K, C_in, C_out)
        scale = np.asarray(params["conv"][i]["scale"], np.float32).reshape(-1)
        shift = np.asarray(params["conv"][i]["shift"], np.float32).reshape(-1)
        if i == 0:
            # raw input flattened (c, l) c-major -> row = c*L + l
            n_rows = g["C_in"] * g["L_in"]

            def row(ip, c, _g=g):
                return c * _g["L_in"] + ip
        else:
            # previous pooled activation, lane-uncompacted: position q at lane q*pool*C_prev + c
            n_rows = prev_keep
            stride_lanes = pool * geo[i - 1]["C_out"]

            def row(ip, c, _s=stride_lanes):
                return ip * _s + c
        # Toeplitz-style conv matrix: zero-padding is baked into missing (zero) rows.
        M = np.zeros((n_rows, g["L_out"] * g["C_out"]), np.float32)
        for p in range(g["L_out"]):
            for k in range(g["K"]):
                ip = p * g["s"] + k - g["pad"]
                if 0 <= ip < g["L_in"]:
                    for cc in range(g["C_in"]):
                        M[row(ip, cc), p * g["C_out"]:(p + 1) * g["C_out"]] = w[k, cc, :]
        args += [jnp.asarray(M),
                 jnp.asarray(np.tile(scale, g["L_out"])[None, :]),   # (1, L_out*C_out)
                 jnp.asarray(np.tile(shift, g["L_out"])[None, :])]
        prev_keep = g["L_out"] * g["C_out"] - (pool - 1) * g["C_out"]

    g_last = geo[-1]
    T = g_last["Lp"]                                              # LSTM sequence length
    F = g_last["C_out"]                                           # LSTM layer-0 input size
    assert F == config["input_size"], (F, config["input_size"])
    stride_t = pool * g_last["C_out"]
    NW = T + NL - 1
    BW = NL * G

    # Hoisted layer-0 input-path weight reading the uncompacted pooled lanes, per wavefront step.
    w_ih0 = np.asarray(params["lstm"][0]["w_ih_t"], np.float32)   # (F, 4H)
    Wx = np.zeros((prev_keep, NW * BW), np.float32)
    for t in range(T):
        Wx[t * stride_t: t * stride_t + F, t * BW: t * BW + G] = w_ih0
    bias_big = np.zeros((1, NW * BW), np.float32)
    for ws in range(NW):
        for l in range(NL):
            bias_big[0, ws * BW + l * G: ws * BW + (l + 1) * G] = \
                np.asarray(params["lstm"][l]["b"], np.float32).reshape(-1)
    # Block recurrent weight: rows for layer l feed its own W_hh and layer l+1's W_ih.
    Wr = np.zeros((NL * H, NL * G), np.float32)
    for l in range(NL):
        Wr[l * H:(l + 1) * H, l * G:(l + 1) * G] = np.asarray(params["lstm"][l]["w_hh_t"],
                                                              np.float32)
        if l + 1 < NL:
            Wr[l * H:(l + 1) * H, (l + 1) * G:(l + 2) * G] = \
                np.asarray(params["lstm"][l + 1]["w_ih_t"], np.float32)

    out_pad = ((O + 127) // 128) * 128                            # lane-dense FC output
    Wfc = np.zeros((H, out_pad), np.float32)
    Wfc[:, :O] = np.asarray(params["fc"]["w_t"], np.float32)
    bfc = np.zeros((1, out_pad), np.float32)
    bfc[0, :O] = np.asarray(params["fc"]["b"], np.float32).reshape(-1)

    args += [jnp.asarray(Wx), jnp.asarray(bias_big), jnp.asarray(Wr),
             jnp.asarray(Wfc), jnp.asarray(bfc)]

    meta = dict(conv_channels=tuple(g["C_out"] for g in geo), pool=pool,
                hidden_size=H, seq_len=T, num_layers=NL, out_pad=out_pad)
    return args, meta


# ----------------------------------------------------------------------------
# Pure-JAX reference (for numerical cross-check only)
# ----------------------------------------------------------------------------
def lstm_cnn_reference(x, params, config):
    x = x[:, 0]
    B = x.shape[0]
    pad = config["padding"]
    pool = config["pool_size"]
    h = jnp.transpose(x, (0, 2, 1))                               # (B, L, C)
    for i in range(config["layers"]):
        p = params["conv"][i]
        K = config["kernel_size"][i]
        s = config["strides"][i]
        hp = jnp.pad(h, ((0, 0), (pad, pad), (0, 0)))
        L_out = (hp.shape[1] - K) // s + 1
        cols = jnp.stack([hp[:, k:k + (L_out - 1) * s + 1:s, :] for k in range(K)], axis=2)
        y = jnp.einsum("blkc,kco->blo", cols, p["w"]) * p["scale"][None] + p["shift"][None]
        y = jnp.maximum(y, 0.0)
        Lp = L_out // pool
        h = y[:, :Lp * pool, :].reshape(B, Lp, pool, -1).max(axis=2)
    seq = jnp.transpose(h, (1, 0, 2))                             # (T, B, F)
    T = seq.shape[0]
    H = config["hidden_size"]
    layer_in = seq
    for l in range(config["num_layers"]):
        lp = params["lstm"][l]
        hh = jnp.zeros((B, H), jnp.float32)
        cc = jnp.zeros((B, H), jnp.float32)
        outs = []
        for t in range(T):
            g = layer_in[t] @ lp["w_ih_t"] + lp["b"][0] + hh @ lp["w_hh_t"]
            i_g = jax.nn.sigmoid(g[:, :H])
            f_g = jax.nn.sigmoid(g[:, H:2 * H])
            g_g = jnp.tanh(g[:, 2 * H:3 * H])
            o_g = jax.nn.sigmoid(g[:, 3 * H:])
            cc = f_g * cc + i_g * g_g
            hh = o_g * jnp.tanh(cc)
            outs.append(hh)
        layer_in = jnp.stack(outs, axis=0)
    return layer_in[-1] @ params["fc"]["w_t"] + params["fc"]["b"][0]


# ----------------------------------------------------------------------------
# Deterministic parameter initialization (synthetic; mirrors module __init__ shapes)
# ----------------------------------------------------------------------------
def init_params(key, config):
    eps = 1e-5
    params = {"conv": [], "lstm": [], "fc": {}}
    in_c = config["in_channels"]
    for i in range(config["layers"]):
        out_c = config["channels"][i]
        K = config["kernel_size"][i]
        key, k1, k2, k3, k4, k5, k6 = jax.random.split(key, 7)
        w = jax.random.normal(k1, (out_c, in_c, K), jnp.float32) * 0.1     # Conv1d weight (O,I,K)
        b = jax.random.normal(k2, (out_c,), jnp.float32) * 0.1             # Conv1d bias
        gamma = jax.random.uniform(k3, (out_c,), jnp.float32, 0.5, 1.5)    # BN weight
        beta = jax.random.normal(k4, (out_c,), jnp.float32) * 0.1          # BN bias
        r_mean = jax.random.normal(k5, (out_c,), jnp.float32) * 0.1        # BN running_mean
        r_var = jax.random.uniform(k6, (out_c,), jnp.float32, 0.5, 1.5)    # BN running_var
        scale = gamma / jnp.sqrt(r_var + eps)
        shift = (b - r_mean) * scale + beta
        params["conv"].append({
            "w": jnp.transpose(w, (2, 1, 0)),            # (K, C_in, C_out) per-tap weights
            "scale": scale[None, :],                     # (1, C_out)  conv-bias+BN(eval) folded
            "shift": shift[None, :],                     # (1, C_out)
        })
        in_c = out_c

    H = config["hidden_size"]
    lstm_in = config["input_size"]
    for _ in range(config["num_layers"]):
        key, k1, k2, k3, k4 = jax.random.split(key, 5)
        s = 1.0 / jnp.sqrt(H)
        w_ih = jax.random.uniform(k1, (4 * H, lstm_in), jnp.float32, -s, s)
        w_hh = jax.random.uniform(k2, (4 * H, H), jnp.float32, -s, s)
        b_ih = jax.random.uniform(k3, (4 * H,), jnp.float32, -s, s)
        b_hh = jax.random.uniform(k4, (4 * H,), jnp.float32, -s, s)
        params["lstm"].append({
            "w_ih_t": w_ih.T,                            # (I, 4H)
            "w_hh_t": w_hh.T,                            # (H, 4H)
            "b": (b_ih + b_hh)[None, :],                 # (1, 4H)
        })
        lstm_in = H

    O = config["output_size"]
    key, k1, k2 = jax.random.split(key, 3)
    s = 1.0 / jnp.sqrt(H)
    w_fc = jax.random.uniform(k1, (O, H), jnp.float32, -s, s)
    b_fc = jax.random.uniform(k2, (O,), jnp.float32, -s, s)
    params["fc"] = {"w_t": w_fc.T, "b": b_fc[None, :]}
    return params


# ----------------------------------------------------------------------------
if __name__ == "__main__":
    config = {
        "in_channels": 4,        # num_feats
        "layers": 2,
        "channels": [8, 16],
        "kernel_size": [3, 3],
        "strides": [1, 1],
        "padding": 1,
        "pool_size": 2,
        "drop_prob": 0.1,
        "input_size": 16,        # = channels[-1]
        "num_layers": 2,
        "hidden_size": 32,
        "bidirectional": False,
        "output_size": 5,
    }

    key = jax.random.PRNGKey(0)
    k_params, k_x = jax.random.split(key)
    params = init_params(k_params, config)

    B, num_samples = 2, 16
    x = jax.random.normal(k_x, (B, 1, config["in_channels"], num_samples), dtype=jnp.float32)

    packed_args, meta = pack_params(params, config, num_samples)

    fwd = jax.jit(functools.partial(lstm_cnn_forward, meta=meta, config=config))
    out = fwd(x, packed_args)
    jax.block_until_ready(out)

    assert out.shape == (B, config["output_size"]), out.shape
    assert bool(jnp.all(jnp.isfinite(out)))

    ref = lstm_cnn_reference(x, params, config)
    assert bool(jnp.allclose(out, ref, rtol=1e-3, atol=1e-3)), (out, ref)

    print("KERNEL_OK")
</pallas_src>

<mosaic_0001>
module attributes {stable_mosaic.version = 11 : i64} {
  func.func @lstm_cnn_fused_kernel(%arg0: memref<2x64xf32, #tpu.memory_space<vmem>>, %arg1: memref<64x128xf32, #tpu.memory_space<vmem>>, %arg2: memref<1x128xf32, #tpu.memory_space<vmem>>, %arg3: memref<1x128xf32, #tpu.memory_space<vmem>>, %arg4: memref<120x128xf32, #tpu.memory_space<vmem>>, %arg5: memref<1x128xf32, #tpu.memory_space<vmem>>, %arg6: memref<1x128xf32, #tpu.memory_space<vmem>>, %arg7: memref<112x1280xf32, #tpu.memory_space<vmem>>, %arg8: memref<1x1280xf32, #tpu.memory_space<vmem>>, %arg9: memref<64x256xf32, #tpu.memory_space<vmem>>, %arg10: memref<32x128xf32, #tpu.memory_space<vmem>>, %arg11: memref<1x128xf32, #tpu.memory_space<vmem>>, %arg12: memref<2x128xf32, #tpu.memory_space<vmem>>) attributes {dimension_semantics = [], scalar_prefetch = 0 : i64, scratch_operands = 0 : i64, tpu.core_type = #tpu.core_type<tc>} {
    %c0 = arith.constant 0 : index
    %c0_0 = arith.constant 0 : index
    %0 = vector.load %arg0[%c0, %c0_0] : memref<2x64xf32, #tpu.memory_space<vmem>>, vector<2x64xf32>
    %c0_1 = arith.constant 0 : index
    %c0_2 = arith.constant 0 : index
    %1 = vector.load %arg1[%c0_1, %c0_2] : memref<64x128xf32, #tpu.memory_space<vmem>>, vector<64x128xf32>
    %cst = arith.constant dense<0.000000e+00> : vector<2x128xf32>
    %2 = tpu.matmul %0, %1, %cst {dimension_numbers = #tpu.dot_dimension_numbers<[1], [0], [0], [1], [0, 0, 1, 1], [], []>} : vector<2x64xf32>, vector<64x128xf32>, vector<2x128xf32> -> vector<2x128xf32>
    %c0_3 = arith.constant 0 : index
    %c0_4 = arith.constant 0 : index
    %3 = vector.load %arg2[%c0_3, %c0_4] : memref<1x128xf32, #tpu.memory_space<vmem>>, vector<1x128xf32>
    %4 = vector.broadcast %3 : vector<1x128xf32> to vector<2x128xf32>
    %5 = arith.mulf %2, %4 : vector<2x128xf32>
    %c0_5 = arith.constant 0 : index
    %c0_6 = arith.constant 0 : index
    %6 = vector.load %arg3[%c0_5, %c0_6] : memref<1x128xf32, #tpu.memory_space<vmem>>, vector<1x128xf32>
    %7 = vector.broadcast %6 : vector<1x128xf32> to vector<2x128xf32>
    %8 = arith.addf %5, %7 : vector<2x128xf32>
    %cst_7 = arith.constant 0.000000e+00 : f32
    %9 = vector.broadcast %cst_7 : f32 to vector<2x128xf32>
    %10 = arith.maximumf %8, %9 : vector<2x128xf32>
    %11 = vector.extract_strided_slice %10 {offsets = [0, 0], sizes = [2, 120], strides = [1, 1]} : vector<2x128xf32> to vector<2x120xf32>
    %12 = vector.extract_strided_slice %10 {offsets = [0, 8], sizes = [2, 120], strides = [1, 1]} : vector<2x128xf32> to vector<2x120xf32>
    %13 = arith.maximumf %11, %12 : vector<2x120xf32>
    %c0_8 = arith.constant 0 : index
    %c0_9 = arith.constant 0 : index
    %14 = vector.load %arg4[%c0_8, %c0_9] : memref<120x128xf32, #tpu.memory_space<vmem>>, vector<120x128xf32>
    %cst_10 = arith.constant dense<0.000000e+00> : vector<2x128xf32>
    %15 = tpu.matmul %13, %14, %cst_10 {dimension_numbers = #tpu.dot_dimension_numbers<[1], [0], [0], [1], [0, 0, 1, 1], [], []>} : vector<2x120xf32>, vector<120x128xf32>, vector<2x128xf32> -> vector<2x128xf32>
    %c0_11 = arith.constant 0 : index
    %c0_12 = arith.constant 0 : index
    %16 = vector.load %arg5[%c0_11, %c0_12] : memref<1x128xf32, #tpu.memory_space<vmem>>, vector<1x128xf32>
    %17 = vector.broadcast %16 : vector<1x128xf32> to vector<2x128xf32>
    %18 = arith.mulf %15, %17 : vector<2x128xf32>
    %c0_13 = arith.constant 0 : index
    %c0_14 = arith.constant 0 : index
    %19 = vector.load %arg6[%c0_13, %c0_14] : memref<1x128xf32, #tpu.memory_space<vmem>>, vector<1x128xf32>
    %20 = vector.broadcast %19 : vector<1x128xf32> to vector<2x128xf32>
    %21 = arith.addf %18, %20 : vector<2x128xf32>
    %cst_15 = arith.constant 0.000000e+00 : f32
    %22 = vector.broadcast %cst_15 : f32 to vector<2x128xf32>
    %23 = arith.maximumf %21, %22 : vector<2x128xf32>
    %24 = vector.extract_strided_slice %23 {offsets = [0, 0], sizes = [2, 112], strides = [1, 1]} : vector<2x128xf32> to vector<2x112xf32>
    %25 = vector.extract_strided_slice %23 {offsets = [0, 16], sizes = [2, 112], strides = [1, 1]} : vector<2x128xf32> to vector<2x112xf32>
    %26 = arith.maximumf %24, %25 : vector<2x112xf32>
    %c0_16 = arith.constant 0 : index
    %c0_17 = arith.constant 0 : index
    %27 = vector.load %arg7[%c0_16, %c0_17] : memref<112x1280xf32, #tpu.memory_space<vmem>>, vector<112x1280xf32>
    %cst_18 = arith.constant dense<0.000000e+00> : vector<2x1280xf32>
    %28 = tpu.matmul %26, %27, %cst_18 {dimension_numbers = #tpu.dot_dimension_numbers<[1], [0], [0], [1], [0, 0, 1, 1], [], []>} : vector<2x112xf32>, vector<112x1280xf32>, vector<2x1280xf32> -> vector<2x1280xf32>
    %c0_19 = arith.constant 0 : index
    %c0_20 = arith.constant 0 : index
    %29 = vector.load %arg8[%c0_19, %c0_20] : memref<1x1280xf32, #tpu.memory_space<vmem>>, vector<1x1280xf32>
    %30 = vector.broadcast %29 : vector<1x1280xf32> to vector<2x1280xf32>
    %31 = arith.addf %28, %30 : vector<2x1280xf32>
    %c0_21 = arith.constant 0 : index
    %c0_22 = arith.constant 0 : index
    %32 = vector.load %arg9[%c0_21, %c0_22] : memref<64x256xf32, #tpu.memory_space<vmem>>, vector<64x256xf32>
    %33 = vector.extract_strided_slice %32 {offsets = [0, 0], sizes = [32, 256], strides = [1, 1]} : vector<64x256xf32> to vector<32x256xf32>
    %34 = vector.extract_strided_slice %32 {offsets = [32, 0], sizes = [32, 256], strides = [1, 1]} : vector<64x256xf32> to vector<32x256xf32>
    %cst_23 = arith.constant 0.000000e+00 : f32
    %35 = vector.broadcast %cst_23 : f32 to vector<2x32xf32>
    %cst_24 = arith.constant 0.000000e+00 : f32
    %36 = vector.broadcast %cst_24 : f32 to vector<2x32xf32>
    %cst_25 = arith.constant 0.000000e+00 : f32
    %37 = vector.broadcast %cst_25 : f32 to vector<2x32xf32>
    %cst_26 = arith.constant 0.000000e+00 : f32
    %38 = vector.broadcast %cst_26 : f32 to vector<2x32xf32>
    %39 = vector.extract_strided_slice %31 {offsets = [0, 0], sizes = [2, 256], strides = [1, 1]} : vector<2x1280xf32> to vector<2x256xf32>
    %cst_27 = arith.constant dense<0.000000e+00> : vector<2x256xf32>
    %40 = tpu.matmul %35, %33, %cst_27 {dimension_numbers = #tpu.dot_dimension_numbers<[1], [0], [0], [1], [0, 0, 1, 1], [], []>} : vector<2x32xf32>, vector<32x256xf32>, vector<2x256xf32> -> vector<2x256xf32>
    %41 = arith.addf %39, %40 : vector<2x256xf32>
    %cst_28 = arith.constant dense<0.000000e+00> : vector<2x256xf32>
    %42 = tpu.matmul %36, %34, %cst_28 {dimension_numbers = #tpu.dot_dimension_numbers<[1], [0], [0], [1], [0, 0, 1, 1], [], []>} : vector<2x32xf32>, vector<32x256xf32>, vector<2x256xf32> -> vector<2x256xf32>
    %43 = arith.addf %41, %42 : vector<2x256xf32>
    %44 = arith.negf %43 : vector<2x256xf32>
    %45 = math.exp %44 : vector<2x256xf32>
    %cst_29 = arith.constant 1.000000e+00 : f32
    %46 = vector.broadcast %cst_29 : f32 to vector<2x256xf32>
    %47 = arith.addf %46, %45 : vector<2x256xf32>
    %48 = arith.divf %46, %47 : vector<2x256xf32>
    %49 = math.tanh %43 : vector<2x256xf32>
    %50 = vector.extract_strided_slice %48 {offsets = [0, 0], sizes = [2, 32], strides = [1, 1]} : vector<2x256xf32> to vector<2x32xf32>
    %51 = vector.extract_strided_slice %48 {offsets = [0, 32], sizes = [2, 32], strides = [1, 1]} : vector<2x256xf32> to vector<2x32xf32>
    %52 = vector.extract_strided_slice %49 {offsets = [0, 64], sizes = [2, 32], strides = [1, 1]} : vector<2x256xf32> to vector<2x32xf32>
    %53 = vector.extract_strided_slice %48 {offsets = [0, 96], sizes = [2, 32], strides = [1, 1]} : vector<2x256xf32> to vector<2x32xf32>
    %54 = arith.mulf %51, %37 : vector<2x32xf32>
    %55 = arith.mulf %50, %52 : vector<2x32xf32>
    %56 = arith.addf %54, %55 : vector<2x32xf32>
    %57 = math.tanh %56 : vector<2x32xf32>
    %58 = arith.mulf %53, %57 : vector<2x32xf32>
    %59 = vector.extract_strided_slice %31 {offsets = [0, 256], sizes = [2, 256], strides = [1, 1]} : vector<2x1280xf32> to vector<2x256xf32>
    %cst_30 = arith.constant dense<0.000000e+00> : vector<2x256xf32>
    %60 = tpu.matmul %58, %33, %cst_30 {dimension_numbers = #tpu.dot_dimension_numbers<[1], [0], [0], [1], [0, 0, 1, 1], [], []>} : vector<2x32xf32>, vector<32x256xf32>, vector<2x256xf32> -> vector<2x256xf32>
    %61 = arith.addf %59, %60 : vector<2x256xf32>
    %cst_31 = arith.constant dense<0.000000e+00> : vector<2x256xf32>
    %62 = tpu.matmul %36, %34, %cst_31 {dimension_numbers = #tpu.dot_dimension_numbers<[1], [0], [0], [1], [0, 0, 1, 1], [], []>} : vector<2x32xf32>, vector<32x256xf32>, vector<2x256xf32> -> vector<2x256xf32>
    %63 = arith.addf %61, %62 : vector<2x256xf32>
    %64 = arith.negf %63 : vector<2x256xf32>
    %65 = math.exp %64 : vector<2x256xf32>
    %cst_32 = arith.constant 1.000000e+00 : f32
    %66 = vector.broadcast %cst_32 : f32 to vector<2x256xf32>
    %67 = arith.addf %66, %65 : vector<2x256xf32>
    %68 = arith.divf %66, %67 : vector<2x256xf32>
    %69 = math.tanh %63 : vector<2x256xf32>
    %70 = vector.extract_strided_slice %68 {offsets = [0, 0], sizes = [2, 32], strides = [1, 1]} : vector<2x256xf32> to vector<2x32xf32>
    %71 = vector.extract_strided_slice %68 {offsets = [0, 32], sizes = [2, 32], strides = [1, 1]} : vector<2x256xf32> to vector<2x32xf32>
    %72 = vector.extract_strided_slice %69 {offsets = [0, 64], sizes = [2, 32], strides = [1, 1]} : vector<2x256xf32> to vector<2x32xf32>
    %73 = vector.extract_strided_slice %68 {offsets = [0, 96], sizes = [2, 32], strides = [1, 1]} : vector<2x256xf32> to vector<2x32xf32>
    %74 = arith.mulf %71, %56 : vector<2x32xf32>
    %75 = arith.mulf %70, %72 : vector<2x32xf32>
    %76 = arith.addf %74, %75 : vector<2x32xf32>
    %77 = math.tanh %76 : vector<2x32xf32>
    %78 = arith.mulf %73, %77 : vector<2x32xf32>
    %79 = vector.extract_strided_slice %68 {offsets = [0, 128], sizes = [2, 32], strides = [1, 1]} : vector<2x256xf32> to vector<2x32xf32>
    %80 = vector.extract_strided_slice %68 {offsets = [0, 160], sizes = [2, 32], strides = [1, 1]} : vector<2x256xf32> to vector<2x32xf32>
    %81 = vector.extract_strided_slice %69 {offsets = [0, 192], sizes = [2, 32], strides = [1, 1]} : vector<2x256xf32> to vector<2x32xf32>
    %82 = vector.extract_strided_slice %68 {offsets = [0, 224], sizes = [2, 32], strides = [1, 1]} : vector<2x256xf32> to vector<2x32xf32>
    %83 = arith.mulf %80, %38 : vector<2x32xf32>
    %84 = arith.mulf %79, %81 : vector<2x32xf32>
    %85 = arith.addf %83, %84 : vector<2x32xf32>
    %86 = math.tanh %85 : vector<2x32xf32>
    %87 = arith.mulf %82, %86 : vector<2x32xf32>
    %88 = vector.extract_strided_slice %31 {offsets = [0, 512], sizes = [2, 256], strides = [1, 1]} : vector<2x1280xf32> to vector<2x256xf32>
    %cst_33 = arith.constant dense<0.000000e+00> : vector<2x256xf32>
    %89 = tpu.matmul %78, %33, %cst_33 {dimension_numbers = #tpu.dot_dimension_numbers<[1], [0], [0], [1], [0, 0, 1, 1], [], []>} : vector<2x32xf32>, vector<32x256xf32>, vector<2x256xf32> -> vector<2x256xf32>
    %90 = arith.addf %88, %89 : vector<2x256xf32>
    %cst_34 = arith.constant dense<0.000000e+00> : vector<2x256xf32>
    %91 = tpu.matmul %87, %34, %cst_34 {dimension_numbers = #tpu.dot_dimension_numbers<[1], [0], [0], [1], [0, 0, 1, 1], [], []>} : vector<2x32xf32>, vector<32x256xf32>, vector<2x256xf32> -> vector<2x256xf32>
    %92 = arith.addf %90, %91 : vector<2x256xf32>
    %93 = arith.negf %92 : vector<2x256xf32>
    %94 = math.exp %93 : vector<2x256xf32>
    %cst_35 = arith.constant 1.000000e+00 : f32
    %95 = vector.broadcast %cst_35 : f32 to vector<2x256xf32>
    %96 = arith.addf %95, %94 : vector<2x256xf32>
    %97 = arith.divf %95, %96 : vector<2x256xf32>
    %98 = math.tanh %92 : vector<2x256xf32>
    %99 = vector.extract_strided_slice %97 {offsets = [0, 0], sizes = [2, 32], strides = [1, 1]} : vector<2x256xf32> to vector<2x32xf32>
    %100 = vector.extract_strided_slice %97 {offsets = [0, 32], sizes = [2, 32], strides = [1, 1]} : vector<2x256xf32> to vector<2x32xf32>
    %101 = vector.extract_strided_slice %98 {offsets = [0, 64], sizes = [2, 32], strides = [1, 1]} : vector<2x256xf32> to vector<2x32xf32>
    %102 = vector.extract_strided_slice %97 {offsets = [0, 96], sizes = [2, 32], strides = [1, 1]} : vector<2x256xf32> to vector<2x32xf32>
    %103 = arith.mulf %100, %76 : vector<2x32xf32>
    %104 = arith.mulf %99, %101 : vector<2x32xf32>
    %105 = arith.addf %103, %104 : vector<2x32xf32>
    %106 = math.tanh %105 : vector<2x32xf32>
    %107 = arith.mulf %102, %106 : vector<2x32xf32>
    %108 = vector.extract_strided_slice %97 {offsets = [0, 128], sizes = [2, 32], strides = [1, 1]} : vector<2x256xf32> to vector<2x32xf32>
    %109 = vector.extract_strided_slice %97 {offsets = [0, 160], sizes = [2, 32], strides = [1, 1]} : vector<2x256xf32> to vector<2x32xf32>
    %110 = vector.extract_strided_slice %98 {offsets = [0, 192], sizes = [2, 32], strides = [1, 1]} : vector<2x256xf32> to vector<2x32xf32>
    %111 = vector.extract_strided_slice %97 {offsets = [0, 224], sizes = [2, 32], strides = [1, 1]} : vector<2x256xf32> to vector<2x32xf32>
    %112 = arith.mulf %109, %85 : vector<2x32xf32>
    %113 = arith.mulf %108, %110 : vector<2x32xf32>
    %114 = arith.addf %112, %113 : vector<2x32xf32>
    %115 = math.tanh %114 : vector<2x32xf32>
    %116 = arith.mulf %111, %115 : vector<2x32xf32>
    %117 = vector.extract_strided_slice %31 {offsets = [0, 768], sizes = [2, 256], strides = [1, 1]} : vector<2x1280xf32> to vector<2x256xf32>
    %cst_36 = arith.constant dense<0.000000e+00> : vector<2x256xf32>
    %118 = tpu.matmul %107, %33, %cst_36 {dimension_numbers = #tpu.dot_dimension_numbers<[1], [0], [0], [1], [0, 0, 1, 1], [], []>} : vector<2x32xf32>, vector<32x256xf32>, vector<2x256xf32> -> vector<2x256xf32>
    %119 = arith.addf %117, %118 : vector<2x256xf32>
    %cst_37 = arith.constant dense<0.000000e+00> : vector<2x256xf32>
    %120 = tpu.matmul %116, %34, %cst_37 {dimension_numbers = #tpu.dot_dimension_numbers<[1], [0], [0], [1], [0, 0, 1, 1], [], []>} : vector<2x32xf32>, vector<32x256xf32>, vector<2x256xf32> -> vector<2x256xf32>
    %121 = arith.addf %119, %120 : vector<2x256xf32>
    %122 = arith.negf %121 : vector<2x256xf32>
    %123 = math.exp %122 : vector<2x256xf32>
    %cst_38 = arith.constant 1.000000e+00 : f32
    %124 = vector.broadcast %cst_38 : f32 to vector<2x256xf32>
    %125 = arith.addf %124, %123 : vector<2x256xf32>
    %126 = arith.divf %124, %125 : vector<2x256xf32>
    %127 = math.tanh %121 : vector<2x256xf32>
    %128 = vector.extract_strided_slice %126 {offsets = [0, 0], sizes = [2, 32], strides = [1, 1]} : vector<2x256xf32> to vector<2x32xf32>
    %129 = vector.extract_strided_slice %126 {offsets = [0, 32], sizes = [2, 32], strides = [1, 1]} : vector<2x256xf32> to vector<2x32xf32>
    %130 = vector.extract_strided_slice %127 {offsets = [0, 64], sizes = [2, 32], strides = [1, 1]} : vector<2x256xf32> to vector<2x32xf32>
    %131 = vector.extract_strided_slice %126 {offsets = [0, 96], sizes = [2, 32], strides = [1, 1]} : vector<2x256xf32> to vector<2x32xf32>
    %132 = arith.mulf %129, %105 : vector<2x32xf32>
    %133 = arith.mulf %128, %130 : vector<2x32xf32>
    %134 = arith.addf %132, %133 : vector<2x32xf32>
    %135 = math.tanh %134 : vector<2x32xf32>
    %136 = arith.mulf %131, %135 : vector<2x32xf32>
    %137 = vector.extract_strided_slice %126 {offsets = [0, 128], sizes = [2, 32], strides = [1, 1]} : vector<2x256xf32> to vector<2x32xf32>
    %138 = vector.extract_strided_slice %126 {offsets = [0, 160], sizes = [2, 32], strides = [1, 1]} : vector<2x256xf32> to vector<2x32xf32>
    %139 = vector.extract_strided_slice %127 {offsets = [0, 192], sizes = [2, 32], strides = [1, 1]} : vector<2x256xf32> to vector<2x32xf32>
    %140 = vector.extract_strided_slice %126 {offsets = [0, 224], sizes = [2, 32], strides = [1, 1]} : vector<2x256xf32> to vector<2x32xf32>
    %141 = arith.mulf %138, %114 : vector<2x32xf32>
    %142 = arith.mulf %137, %139 : vector<2x32xf32>
    %143 = arith.addf %141, %142 : vector<2x32xf32>
    %144 = math.tanh %143 : vector<2x32xf32>
    %145 = arith.mulf %140, %144 : vector<2x32xf32>
    %146 = vector.extract_strided_slice %31 {offsets = [0, 1024], sizes = [2, 256], strides = [1, 1]} : vector<2x1280xf32> to vector<2x256xf32>
    %cst_39 = arith.constant dense<0.000000e+00> : vector<2x256xf32>
    %147 = tpu.matmul %136, %33, %cst_39 {dimension_numbers = #tpu.dot_dimension_numbers<[1], [0], [0], [1], [0, 0, 1, 1], [], []>} : vector<2x32xf32>, vector<32x256xf32>, vector<2x256xf32> -> vector<2x256xf32>
    %148 = arith.addf %146, %147 : vector<2x256xf32>
    %cst_40 = arith.constant dense<0.000000e+00> : vector<2x256xf32>
    %149 = tpu.matmul %145, %34, %cst_40 {dimension_numbers = #tpu.dot_dimension_numbers<[1], [0], [0], [1], [0, 0, 1, 1], [], []>} : vector<2x32xf32>, vector<32x256xf32>, vector<2x256xf32> -> vector<2x256xf32>
    %150 = arith.addf %148, %149 : vector<2x256xf32>
    %151 = arith.negf %150 : vector<2x256xf32>
    %152 = math.exp %151 : vector<2x256xf32>
    %cst_41 = arith.constant 1.000000e+00 : f32
    %153 = vector.broadcast %cst_41 : f32 to vector<2x256xf32>
    %154 = arith.addf %153, %152 : vector<2x256xf32>
    %155 = arith.divf %153, %154 : vector<2x256xf32>
    %156 = math.tanh %150 : vector<2x256xf32>
    %157 = vector.extract_strided_slice %155 {offsets = [0, 128], sizes = [2, 32], strides = [1, 1]} : vector<2x256xf32> to vector<2x32xf32>
    %158 = vector.extract_strided_slice %155 {offsets = [0, 160], sizes = [2, 32], strides = [1, 1]} : vector<2x256xf32> to vector<2x32xf32>
    %159 = vector.extract_strided_slice %156 {offsets = [0, 192], sizes = [2, 32], strides = [1, 1]} : vector<2x256xf32> to vector<2x32xf32>
    %160 = vector.extract_strided_slice %155 {offsets = [0, 224], sizes = [2, 32], strides = [1, 1]} : vector<2x256xf32> to vector<2x32xf32>
    %161 = arith.mulf %158, %143 : vector<2x32xf32>
    %162 = arith.mulf %157, %159 : vector<2x32xf32>
    %163 = arith.addf %161, %162 : vector<2x32xf32>
    %164 = math.tanh %163 : vector<2x32xf32>
    %165 = arith.mulf %160, %164 : vector<2x32xf32>
    %c0_42 = arith.constant 0 : index
    %c0_43 = arith.constant 0 : index
    %166 = vector.load %arg10[%c0_42, %c0_43] : memref<32x128xf32, #tpu.memory_space<vmem>>, vector<32x128xf32>
    %cst_44 = arith.constant dense<0.000000e+00> : vector<2x128xf32>
    %167 = tpu.matmul %165, %166, %cst_44 {dimension_numbers = #tpu.dot_dimension_numbers<[1], [0], [0], [1], [0, 0, 1, 1], [], []>} : vector<2x32xf32>, vector<32x128xf32>, vector<2x128xf32> -> vector<2x128xf32>
    %c0_45 = arith.constant 0 : index
    %c0_46 = arith.constant 0 : index
    %168 = vector.load %arg11[%c0_45, %c0_46] : memref<1x128xf32, #tpu.memory_space<vmem>>, vector<1x128xf32>
    %169 = vector.broadcast %168 : vector<1x128xf32> to vector<2x128xf32>
    %170 = arith.addf %167, %169 : vector<2x128xf32>
    %c0_47 = arith.constant 0 : index
    %c0_48 = arith.constant 0 : index
    %171 = vector.load %arg12[%c0_47, %c0_48] : memref<2x128xf32, #tpu.memory_space<vmem>>, vector<2x128xf32>
    tpu.vector_store %arg12[%c0_47, %c0_48], %170 {strides = array<i32>} : memref<2x128xf32, #tpu.memory_space<vmem>>, vector<2x128xf32>,
    return
  }
}

</mosaic_0001>

<bundles_post_ra>
// kernel: squeeze.1
= control target key start
LH: loop header
LB: loop body
LE: loop exit
PB: predicated region body
PF: predicated region fallthrough
CT: control target
= control target key end

     0   :  { %2 = vsyncpa [#allocation1], 0  ;;  %s81_s6 = smov [#allocation0]   ;;  %s101_s0 = inlined_call_operand.hbm [shape: f32[2,1,4,16], index: 0, kind: input, shape index: {}]   ;;  %s102_s1 = inlined_call_operand.vmem [shape: f32[2,64], index: 1, kind: output, shape index: {}]  }
   0x1   :  { %s7_s7 = sshll.u32 %s81_s6, 4  ;;  %s8_s7 = int_to_ptr.vmem [resolvable:$true] %s7_s7 }
   0x2   :  { %s67_s8 = scalar_lea.vmem %s8_s7, 128  ;;  %p72_p1 = scmp.lt.s32.totalorder %s8_s7, %s8_s7 }
   0x3   :  { %p68_p0 = scmp.ne.s32.totalorder %s8_s7, %s67_s8  ;;  %p73_p2 = scmp.lt.s32.totalorder %s67_s8, %s67_s8 }
   0x5   :  { %p74_p3 = por %p73_p2, %p72_p1 }
   0x7   :  { %p75_p4 = pnand %p74_p3, %p68_p0 }
   0x9   :  { %78 = shalt.err (!%p75_p4)
}
   0xa   :  { %10 = dma.hbm_to_vmem [thread:$0]  %s101_s0, 128, %s8_s7, [#allocation1]  }
   0xb   :  { %79 = dma.done.wait [#allocation1], 128  }
   0xc   :  { %80 = vsyncadd [#allocation1], 4294967168  ;;  %v16_v0 = vld [vmem:[#allocation0 + $0x4] sm:$0xf]  ;;  %v19_v1 = vld [vmem:[#allocation0] sm:$0xf] }
   0xd   :  { %18 = vst [vmem:[#allocation3 + $0x8] sm:$0xf] %v16_v0  ;;  %20 = vst [vmem:[#allocation3] sm:$0xf] %v19_v1  ;;  %s26_s0 = smov 3  ;;  %s40_s11 = smov 3 }
   0xe   :  { %s21_s12 = smov 3  ;;  %s33_s13 = smov 3  ;;  %vm23_vm0 = vcmask 130048   ;;  %vm30_vm1 = vcmask 523648   ;;  %vm37_vm2 = vcmask 392448   ;;  %vm44_vm3 = vcmask 261248  }
   0xf   :  { %s82_s14 = smov 48   ;;  %s83_s15 = smov 16  }
  0x10   :  { %s84_s16 = smov 32  }
  0x14   :  { %v27_v2 = vld [vmem:[#allocation3 + $0x3] ss:$8 sm:%s26_s0]   ;;  %v41_v3 = vld [vmem:[#allocation3 + $0x1] ss:$8 sm:%s40_s11]   ;;  %v22_v4 = vld [vmem:[#allocation3] ss:$8 sm:%s21_s12]  }
  0x15   :  { %28 = vrot.lane.b32.xlu0 %v27_v2, %s82_s14  ;;  %42 = vrot.lane.b32.xlu1 %v41_v3, %s83_s15  ;;  %v34_v5 = vld [vmem:[#allocation3 + $0x2] ss:$8 sm:%s33_s13]   ;;  %24 = vst.msk [vmem:[#allocation2] sm:$0x3] %vm23_vm0, %v22_v4  }
  0x19   :  { %35 = vrot.lane.b32.xlu0 %v34_v5, %s84_s16 }
  0x87   :  { %v29_v6 = vpop.permute.xlu0 %28   ;;  %v43_v7 = vpop.permute.xlu1 %42  }
  0x88   :  { %31 = vst.msk [vmem:[#allocation2] sm:$0x3] %vm30_vm1, %v29_v6  }
  0x8b   :  { %v36_v8 = vpop.permute.xlu0 %35  }
  0x8c   :  { %38 = vst.msk [vmem:[#allocation2] sm:$0x3] %vm37_vm2, %v36_v8  }
  0x8d   :  { %45 = vst.msk [vmem:[#allocation2] sm:$0x3] %vm44_vm3, %v43_v7  }
  0x94   :  { %v50_v9 = vld [vmem:[#allocation2] sm:$0x3] }
  0x95   :  { %53 = vst [vmem:[%s102_s1] sm:$0x3] %v50_v9 }
  0x96   :  { %54 = vsyncpa [#allocation1], 1 }

// kernel: lstm_cnn_forward.1
= control target key start
LH: loop header
LB: loop body
LE: loop exit
PB: predicated region body
PF: predicated region fallthrough
CT: control target
= control target key end

     0   :  { %17 = vsyncpa [#allocation3], 0  ;;  %s2590_s0 = inlined_call_operand.vmem [shape: f32[2,64], index: 0, kind: input, shape index: {}]   ;;  %s2591_s1 = inlined_call_operand.hbm [shape: f32[64,128], index: 1, kind: input, shape index: {}]   ;;  %s2592_s2 = inlined_call_operand.vmem [shape: f32[1,128], index: 2, kind: input, shape index: {}]   ;;  %s2593_s3 = inlined_call_operand.vmem [shape: f32[1,128], index: 3, kind: input, shape index: {}]   ;;  %s2594_s4 = inlined_call_operand.hbm [shape: f32[120,128], index: 4, kind: input, shape index: {}]   ;;  %s2595_s5 = inlined_call_operand.vmem [shape: f32[1,128], index: 5, kind: input, shape index: {}]   ;;  %s2596_s6 = inlined_call_operand.vmem [shape: f32[1,128], index: 6, kind: input, shape index: {}]   ;;  %s2597_s7 = inlined_call_operand.hbm [shape: f32[112,1280], index: 7, kind: input, shape index: {}]   ;;  %s2598_s8 = inlined_call_operand.vmem [shape: f32[1,1280], index: 8, kind: input, shape index: {}]   ;;  %s2599_s9 = inlined_call_operand.hbm [shape: f32[64,256], index: 9, kind: input, shape index: {}]   ;;  %s2600_s10 = inlined_call_operand.hbm [shape: f32[32,128], index: 10, kind: input, shape index: {}]   ;;  %s2601_s11 = inlined_call_operand.vmem [shape: f32[1,128], index: 11, kind: input, shape index: {}]   ;;  %s2602_s12 = inlined_call_operand.hbm [shape: f32[2,128], index: 12, kind: output, shape index: {}]  }
   0x1   :  { %18 = vsyncpa [#allocation6], 0 }
   0x2   :  { %19 = vsyncpa [#allocation9], 0 }
   0x3   :  { %20 = vsyncpa [#allocation4], 0  ;;  %s2201_s21 = smov [#allocation5]   ;;  %s2202_s23 = smov [#allocation8]  }
   0x4   :  { %s44_s22 = sshll.u32 %s2201_s21, 4  ;;  %s74_s24 = sshll.u32 %s2202_s23, 4  ;;  %s45_s22 = int_to_ptr.vmem [resolvable:$true] %s44_s22  ;;  %s75_s24 = int_to_ptr.vmem [resolvable:$true] %s74_s24 }
   0x5   :  { %s2081_s25 = scalar_lea.vmem %s45_s22, 1920  ;;  %p2086_p1 = scmp.lt.s32.totalorder %s45_s22, %s45_s22 }
   0x6   :  { %p2082_p0 = scmp.ne.s32.totalorder %s45_s22, %s2081_s25  ;;  %p2087_p2 = scmp.lt.s32.totalorder %s2081_s25, %s2081_s25 }
   0x8   :  { %p2088_p3 = por %p2087_p2, %p2086_p1 }
   0xa   :  { %p2089_p4 = pnand %p2088_p3, %p2082_p0 }
   0xc   :  { %2092 = shalt.err (!%p2089_p4)
}
   0xd   :  { %s2203_s26 = smov 128   ;;  %s2204_s27 = smov 8  }
   0xe   :  { %50 = dma.hbm_to_vmem [thread:$0]  %s2594_s4, 1920, %s45_s22, [#allocation6], %s2203_s26, %s2203_s26, %s2204_s27  }
   0xf   :  { %s2101_s30 = scalar_lea.vmem %s75_s24, 2048  ;;  %p2106_p6 = scmp.lt.s32.totalorder %s75_s24, %s75_s24 }
  0x10   :  { %p2102_p5 = scmp.ne.s32.totalorder %s75_s24, %s2101_s30  ;;  %p2107_p7 = scmp.lt.s32.totalorder %s2101_s30, %s2101_s30 }
  0x12   :  { %p2108_p8 = por %p2107_p7, %p2106_p6 }
  0x14   :  { %p2109_p9 = pnand %p2108_p8, %p2102_p5 }
  0x16   :  { %2112 = shalt.err (!%p2109_p9)
}
  0x17   :  { %s2205_s13 = smov 256   ;;  %s2206_s14 = smov 16  }
  0x18   :  { %80 = dma.hbm_to_vmem [thread:$0]  %s2599_s9, 2048, %s75_s24, [#allocation9], %s2205_s13, %s2205_s13, %s2206_s14  }
  0x19   :  { %s2207_s17 = smov [#allocation2]   ;;  %s2208_s19 = smov [#allocation7]  }
  0x1a   :  { %s28_s18 = sshll.u32 %s2207_s17, 4  ;;  %s60_s20 = sshll.u32 %s2208_s19, 4  ;;  %s29_s18 = int_to_ptr.vmem [resolvable:$true] %s28_s18  ;;  %s61_s20 = int_to_ptr.vmem [resolvable:$true] %s60_s20 }
  0x1b   :  { %s2121_s4 = scalar_lea.vmem %s29_s18, 1024  ;;  %p2126_p11 = scmp.lt.s32.totalorder %s29_s18, %s29_s18 }
  0x1c   :  { %p2122_p10 = scmp.ne.s32.totalorder %s29_s18, %s2121_s4  ;;  %p2127_p12 = scmp.lt.s32.totalorder %s2121_s4, %s2121_s4 }
  0x1e   :  { %p2128_p13 = por %p2127_p12, %p2126_p11 }
  0x20   :  { %p2129_p0 = pnand %p2128_p13, %p2122_p10 }
  0x22   :  { %2132 = shalt.err (!%p2129_p0)
}
  0x23   :  { %34 = dma.hbm_to_vmem [thread:$0]  %s2591_s1, 1024, %s29_s18, [#allocation3], %s2203_s26, %s2203_s26, %s2204_s27  }
  0x24   :  { %s2141_s9 = scalar_lea.vmem %s61_s20, 17920  ;;  %p2146_p2 = scmp.lt.s32.totalorder %s61_s20, %s61_s20 }
  0x25   :  { %p2142_p1 = scmp.ne.s32.totalorder %s61_s20, %s2141_s9  ;;  %p2147_p3 = scmp.lt.s32.totalorder %s2141_s9, %s2141_s9 }
  0x27   :  { %p2148_p4 = por %p2147_p3, %p2146_p2 }
  0x29   :  { %p2149_p5 = pnand %p2148_p4, %p2142_p1 }
  0x2b   :  { %2152 = shalt.err (!%p2149_p5)
}
  0x2c   :  { %s2209_s23 = smov 1280   ;;  %s2210_s24 = smov 80  }
  0x2d   :  { %66 = dma.hbm_to_vmem [thread:$0]  %s2597_s7, 17920, %s61_s20, [#allocation6], %s2209_s23, %s2209_s23, %s2210_s24  }
  0x2e   :  { %s2211_s29 = smov [#allocation10]  }
  0x2f   :  { %s86_s30 = sshll.u32 %s2211_s29, 4  ;;  %s87_s30 = int_to_ptr.vmem [resolvable:$true] %s86_s30 }
  0x30   :  { %s2161_s13 = scalar_lea.vmem %s87_s30, 512  ;;  %p2166_p7 = scmp.lt.s32.totalorder %s87_s30, %s87_s30 }
  0x31   :  { %p2162_p6 = scmp.ne.s32.totalorder %s87_s30, %s2161_s13  ;;  %p2167_p8 = scmp.lt.s32.totalorder %s2161_s13, %s2161_s13 }
  0x33   :  { %p2168_p9 = por %p2167_p8, %p2166_p7 }
  0x35   :  { %p2169_p10 = pnand %p2168_p9, %p2162_p6 }
  0x37   :  { %2172 = shalt.err (!%p2169_p10)
}
  0x38   :  { %92 = dma.hbm_to_vmem [thread:$0]  %s2600_s10, 512, %s87_s30, [#allocation9], %s2203_s26, %s2203_s26, %s2204_s27  }
  0x39   :  { %2193 = dma.done.wait [#allocation3], 1024  }
  0x3a   :  { %2194 = vsyncadd [#allocation3], 4294966272 }
  0x3b   :  { %2195 = dma.done.wait [#allocation6], 19840  }
  0x3c   :  { %2196 = vsyncadd [#allocation6], 4294947456 }
  0x3d   :  { %2197 = dma.done.wait [#allocation9], 2560  }
  0x3e   :  { %2198 = vsyncadd [#allocation9], 4294964736  ;;  %v2212_v0 = vmov 0.0   ;;  %vm2213_vm0 = vmmov 0   ;;  %v118_v1 = vld [vmem:[#allocation2 + $0x38] sm:$0xff]  ;;  %v117_v2 = vld [vmem:[#allocation2 + $0x30] sm:$0xff] }
  0x3f   :  { %1928 = vmatprep.subr.mxu0 %v2212_v0  ;;  %1944 = vmatprep.mubr.msk.f32.mxu0 %vm2213_vm0, %v2212_v0  ;;  %v116_v3 = vld [vmem:[#allocation2 + $0x28] sm:$0xff]  ;;  %v115_v4 = vld [vmem:[#allocation2 + $0x20] sm:$0xff]  ;;  %v114_v5 = vld [vmem:[#allocation2 + $0x18] sm:$0xff]  ;;  %vm119_vm1 = vcmask 523264   ;;  %s2214_s16 = smov 120   ;;  %vm230_vm2 = vcmask 982016  }
  0x40   :  { %1947 = vmatprep.subr.mxu1 %v2212_v0  ;;  %1977 = vmatprep.mubr.msk.f32.mxu1 %vm2213_vm0, %v2212_v0  ;;  %v113_v6 = vld [vmem:[#allocation2 + $0x10] sm:$0xff]  ;;  %v112_v7 = vld [vmem:[#allocation2 + $0x8] sm:$0xff]  ;;  %v111_v8 = vld [vmem:[#allocation2] sm:$0xff]  ;;  %s2215_s19 = smov 112   ;;  %vm510_vm3 = vcmask 916480   ;;  %s2216_s20 = smov 64  }
  0x41   :  { %1929 = vmatpush3.msra.mxu0 %v118_v1  ;;  %v110_v9 = vld [vmem:[%s2590_s0] sm:$0x3]  ;;  %v229_v10 = vld [vmem:[#allocation5 + $0x70] sm:$0xff]  ;;  %v228_v11 = vld [vmem:[#allocation5 + $0x68] sm:$0xff]  ;;  %s2217_s4 = smov 32   ;;  %vm883_vm4 = vcmask 261120  }
  0x42   :  { %1930 = vmatprep.subr.mxu0 %v2212_v0  ;;  %1948 = vmatpush3.msra.mxu1 %v229_v10  ;;  %v227_v12 = vld [vmem:[#allocation5 + $0x60] sm:$0xff]  ;;  %v226_v13 = vld [vmem:[#allocation5 + $0x58] sm:$0xff]  ;;  %v225_v14 = vld [vmem:[#allocation5 + $0x50] sm:$0xff]  ;;  %s2218_s23 = smov [#allocation11]  }
  0x43   :  { %1931 = vmatpush3.msra.mxu0 %v117_v2  ;;  %1949 = vmatprep.subr.mxu1 %v2212_v0  ;;  %v224_v15 = vld [vmem:[#allocation5 + $0x48] sm:$0xff]  ;;  %v223_v16 = vld [vmem:[#allocation5 + $0x40] sm:$0xff]  ;;  %v222_v17 = vld [vmem:[#allocation5 + $0x38] sm:$0xff]  ;;  %s1859_s24 = sshll.u32 %s2218_s23, 4  ;;  %s1860_s24 = int_to_ptr.vmem [resolvable:$true] %s1859_s24 }
  0x44   :  { %1932 = vmatprep.subr.mxu0 %v2212_v0  ;;  %1950 = vmatpush3.msra.mxu1 %v228_v11  ;;  %v221_v18 = vld [vmem:[#allocation5 + $0x30] sm:$0xff]  ;;  %v220_v19 = vld [vmem:[#allocation5 + $0x28] sm:$0xff]  ;;  %v219_v20 = vld [vmem:[#allocation5 + $0x20] sm:$0xff]  ;;  %s2173_s25 = scalar_lea.vmem %s1860_s24, 32  ;;  %p2178_p12 = scmp.lt.s32.totalorder %s1860_s24, %s1860_s24 }
  0x45   :  { %1933 = vmatpush3.msra.mxu0 %v116_v3  ;;  %1951 = vmatprep.subr.mxu1 %v2212_v0  ;;  %v218_v21 = vld [vmem:[#allocation5 + $0x18] sm:$0xff]  ;;  %v217_v22 = vld [vmem:[#allocation5 + $0x10] sm:$0xff]  ;;  %v216_v23 = vld [vmem:[#allocation5 + $0x8] sm:$0xff]  ;;  %p2174_p11 = scmp.ne.s32.totalorder %s1860_s24, %s2173_s25  ;;  %p2179_p13 = scmp.lt.s32.totalorder %s2173_s25, %s2173_s25 }
  0x46   :  { %1934 = vmatprep.subr.mxu0 %v2212_v0  ;;  %1952 = vmatpush3.msra.mxu1 %v227_v12  ;;  %v215_v24 = vld [vmem:[#allocation5] sm:$0xff]  ;;  %v457_v34 = vld [vmem:[#allocation7 + $0x418] sm:$0xff]  ;;  %v456_v36 = vld [vmem:[#allocation7 + $0x410] sm:$0xff] }
  0x47   :  { %1935 = vmatpush3.msra.mxu0 %v115_v4  ;;  %1953 = vmatprep.subr.mxu1 %v2212_v0  ;;  %v1871_v25 = vld [vmem:[%s2592_s2] ss:$0 sm:$0xff]  ;;  %v458_v37 = vld [vmem:[#allocation7 + $0x420] sm:$0xff]  ;;  %v449_v39 = vld [vmem:[#allocation7 + $0x3d8] sm:$0xff]  ;;  %p2180_p0 = por %p2179_p13, %p2178_p12 }
  0x48   :  { %1936 = vmatprep.subr.mxu0 %v2212_v0  ;;  %1954 = vmatpush3.msra.mxu1 %v226_v13  ;;  %v1872_v27 = vld [vmem:[%s2593_s3] ss:$0 sm:$0xff]  ;;  %v446_v40 = vld [vmem:[#allocation7 + $0x3c0] sm:$0xff]  ;;  %v448_v41 = vld [vmem:[#allocation7 + $0x3d0] sm:$0xff] }
  0x49   :  { %1937 = vmatpush3.msra.mxu0 %v114_v5  ;;  %1955 = vmatprep.subr.mxu1 %v2212_v0  ;;  %v459_v35 = vld [vmem:[#allocation7 + $0x428] sm:$0xff]  ;;  %v437_v42 = vld [vmem:[#allocation7 + $0x378] sm:$0xff]  ;;  %v436_v44 = vld [vmem:[#allocation7 + $0x370] sm:$0xff]  ;;  %p2181_p1 = pnand %p2180_p0, %p2174_p11 }
  0x4a   :  { %1938 = vmatprep.subr.mxu0 %v2212_v0  ;;  %1956 = vmatpush3.msra.mxu1 %v225_v14  ;;  %v447_v38 = vld [vmem:[#allocation7 + $0x3c8] sm:$0xff]  ;;  %v438_v45 = vld [vmem:[#allocation7 + $0x380] sm:$0xff]  ;;  %v429_v47 = vld [vmem:[#allocation7 + $0x338] sm:$0xff] }
  0x4b   :  { %1939 = vmatpush3.msra.mxu0 %v113_v6  ;;  %1957 = vmatprep.subr.mxu1 %v2212_v0  ;;  %v439_v43 = vld [vmem:[#allocation7 + $0x388] sm:$0xff]  ;;  %v426_v48 = vld [vmem:[#allocation7 + $0x320] sm:$0xff]  ;;  %v428_v49 = vld [vmem:[#allocation7 + $0x330] sm:$0xff] }
  0x4c   :  { %1940 = vmatprep.subr.mxu0 %v2212_v0  ;;  %1958 = vmatpush3.msra.mxu1 %v224_v15  ;;  %v427_v46 = vld [vmem:[#allocation7 + $0x328] sm:$0xff]  ;;  %v417_v50 = vld [vmem:[#allocation7 + $0x2d8] sm:$0xff]  ;;  %v416_v52 = vld [vmem:[#allocation7 + $0x2d0] sm:$0xff] }
  0x4d   :  { %1941 = vmatpush3.msra.mxu0 %v112_v7  ;;  %1959 = vmatprep.subr.mxu1 %v2212_v0  ;;  %v419_v51 = vld [vmem:[#allocation7 + $0x2e8] sm:$0xff]  ;;  %v418_v53 = vld [vmem:[#allocation7 + $0x2e0] sm:$0xff]  ;;  %v409_v55 = vld [vmem:[#allocation7 + $0x298] sm:$0xff] }
  0x4e   :  { %1942 = vmatprep.subr.mxu0 %v2212_v0  ;;  %1960 = vmatpush3.msra.mxu1 %v223_v16  ;;  %v407_v54 = vld [vmem:[#allocation7 + $0x288] sm:$0xff]  ;;  %v406_v56 = vld [vmem:[#allocation7 + $0x280] sm:$0xff]  ;;  %v408_v57 = vld [vmem:[#allocation7 + $0x290] sm:$0xff] }
  0x4f   :  { %1943 = vmatpush3.msra.mxu0 %v111_v8  ;;  %1961 = vmatprep.subr.mxu1 %v2212_v0  ;;  %v397_v58 = vld [vmem:[#allocation7 + $0x238] sm:$0xff]  ;;  %v399_v59 = vld [vmem:[#allocation7 + $0x248] sm:$0xff]  ;;  %v396_v60 = vld [vmem:[#allocation7 + $0x230] sm:$0xff] }
  0x50   :  { %1945 = vmatmul.mubr.msk.f32.vlgmr.msra.gmra.mxu0 %vm119_vm1, %v110_v9  ;;  %1962 = vmatpush3.msra.mxu1 %v222_v17  ;;  %v398_v61 = vld [vmem:[#allocation7 + $0x240] sm:$0xff]  ;;  %v387_v62 = vld [vmem:[#allocation7 + $0x1e8] sm:$0xff]  ;;  %v389_v63 = vld [vmem:[#allocation7 + $0x1f8] sm:$0xff] }
  0x51   :  { %578 = vmatprep.mubr.f32.mxu0 %v2212_v0  ;;  %1963 = vmatprep.subr.mxu1 %v2212_v0  ;;  %v386_v1 = vld [vmem:[#allocation7 + $0x1e0] sm:$0xff]  ;;  %v388_v2 = vld [vmem:[#allocation7 + $0x1f0] sm:$0xff]  ;;  %v377_v3 = vld [vmem:[#allocation7 + $0x198] sm:$0xff] }
  0x52   :  { %1964 = vmatpush3.msra.mxu1 %v221_v18  ;;  %518 = vmatprep.subr.mxu0 %v457_v34  ;;  %v379_v4 = vld [vmem:[#allocation7 + $0x1a8] sm:$0xff]  ;;  %v376_v5 = vld [vmem:[#allocation7 + $0x190] sm:$0xff]  ;;  %v378_v6 = vld [vmem:[#allocation7 + $0x1a0] sm:$0xff] }
  0x53   :  { %1965 = vmatprep.subr.mxu1 %v2212_v0  ;;  %519 = vmatpush1.msra.mxu0 %v456_v36  ;;  %v367_v7 = vld [vmem:[#allocation7 + $0x148] sm:$0xff]  ;;  %v369_v8 = vld [vmem:[#allocation7 + $0x158] sm:$0xff]  ;;  %v366_v9 = vld [vmem:[#allocation7 + $0x140] sm:$0xff] }
  0x54   :  { %1966 = vmatpush3.msra.mxu1 %v220_v19  ;;  %520 = vmatprep.subr.mxu0 %v447_v38  ;;  %v368_v10 = vld [vmem:[#allocation7 + $0x150] sm:$0xff]  ;;  %v357_v11 = vld [vmem:[#allocation7 + $0xf8] sm:$0xff]  ;;  %v359_v12 = vld [vmem:[#allocation7 + $0x108] sm:$0xff] }
  0x55   :  { %1967 = vmatprep.subr.mxu1 %v2212_v0  ;;  %521 = vmatpush1.msra.mxu0 %v446_v40  ;;  %v356_v13 = vld [vmem:[#allocation7 + $0xf0] sm:$0xff]  ;;  %v358_v14 = vld [vmem:[#allocation7 + $0x100] sm:$0xff]  ;;  %v347_v15 = vld [vmem:[#allocation7 + $0xa8] sm:$0xff] }
  0x56   :  { %1968 = vmatpush3.msra.mxu1 %v219_v20  ;;  %522 = vmatprep.subr.mxu0 %v437_v42  ;;  %v349_v16 = vld [vmem:[#allocation7 + $0xb8] sm:$0xff]  ;;  %v346_v17 = vld [vmem:[#allocation7 + $0xa0] sm:$0xff]  ;;  %v348_v18 = vld [vmem:[#allocation7 + $0xb0] sm:$0xff] }
  0x57   :  { %1969 = vmatprep.subr.mxu1 %v2212_v0  ;;  %523 = vmatpush1.msra.mxu0 %v436_v44  ;;  %v337_v19 = vld [vmem:[#allocation7 + $0x58] sm:$0xff]  ;;  %v339_v20 = vld [vmem:[#allocation7 + $0x68] sm:$0xff]  ;;  %v460_v38 = vld [vmem:[#allocation7 + $0x430] sm:$0xff] }
  0x58   :  { %1970 = vmatpush3.msra.mxu1 %v218_v21  ;;  %524 = vmatprep.subr.mxu0 %v427_v46  ;;  %v336_v21 = vld [vmem:[#allocation7 + $0x50] sm:$0xff]  ;;  %v451_v40 = vld [vmem:[#allocation7 + $0x3e8] sm:$0xff]  ;;  %v450_v42 = vld [vmem:[#allocation7 + $0x3e0] sm:$0xff] }
  0x59   :  { %1971 = vmatprep.subr.mxu1 %v2212_v0  ;;  %525 = vmatpush1.msra.mxu0 %v426_v48  ;;  %v441_v44 = vld [vmem:[#allocation7 + $0x398] sm:$0xff]  ;;  %v440_v46 = vld [vmem:[#allocation7 + $0x390] sm:$0xff]  ;;  %v431_v48 = vld [vmem:[#allocation7 + $0x348] sm:$0xff] }
  0x5a   :  { %1972 = vmatpush3.msra.mxu1 %v217_v22  ;;  %526 = vmatprep.subr.mxu0 %v417_v50  ;;  %v338_v22 = vld [vmem:[#allocation7 + $0x60] sm:$0xff] }
  0x5b   :  { %1973 = vmatprep.subr.mxu1 %v2212_v0  ;;  %527 = vmatpush1.msra.mxu0 %v416_v52  ;;  %v430_v50 = vld [vmem:[#allocation7 + $0x340] sm:$0xff]  ;;  %v421_v52 = vld [vmem:[#allocation7 + $0x2f8] sm:$0xff] }
  0x5c   :  { %1974 = vmatpush3.msra.mxu1 %v216_v23  ;;  %528 = vmatprep.subr.mxu0 %v407_v54  ;;  %v327_v23 = vld [vmem:[#allocation7 + $0x8] sm:$0xff]  ;;  %v420_v54 = vld [vmem:[#allocation7 + $0x2f0] sm:$0xff] }
  0x5d   :  { %1975 = vmatprep.subr.mxu1 %v2212_v0  ;;  %529 = vmatpush1.msra.mxu0 %v406_v56  ;;  %v411_v56 = vld [vmem:[#allocation7 + $0x2a8] sm:$0xff] }
  0x5e   :  { %1976 = vmatpush3.msra.mxu1 %v215_v24  ;;  %530 = vmatprep.subr.mxu0 %v397_v58  ;;  %v329_v24 = vld [vmem:[#allocation7 + $0x18] sm:$0xff]  ;;  %v410_v58 = vld [vmem:[#allocation7 + $0x2a0] sm:$0xff] }
  0x5f   :  { %588 = vmatprep.subr.mxu1 %v459_v35  ;;  %531 = vmatpush1.msra.mxu0 %v396_v60  ;;  %v401_v60 = vld [vmem:[#allocation7 + $0x258] sm:$0xff] }
  0x60   :  { %532 = vmatprep.subr.mxu0 %v387_v62  ;;  %v400_v62 = vld [vmem:[#allocation7 + $0x250] sm:$0xff] }
  0x61   :  { %533 = vmatpush1.msra.mxu0 %v386_v1  ;;  %v391_v1 = vld [vmem:[#allocation7 + $0x208] sm:$0xff] }
  0x62   :  { %534 = vmatprep.subr.mxu0 %v377_v3  ;;  %v390_v3 = vld [vmem:[#allocation7 + $0x200] sm:$0xff] }
  0x63   :  { %535 = vmatpush1.msra.mxu0 %v376_v5  ;;  %v381_v5 = vld [vmem:[#allocation7 + $0x1b8] sm:$0xff] }
  0x64   :  { %536 = vmatprep.subr.mxu0 %v367_v7  ;;  %v380_v7 = vld [vmem:[#allocation7 + $0x1b0] sm:$0xff] }
  0x65   :  { %537 = vmatpush1.msra.mxu0 %v366_v9  ;;  %v371_v9 = vld [vmem:[#allocation7 + $0x168] sm:$0xff] }
  0x66   :  { %538 = vmatprep.subr.mxu0 %v357_v11  ;;  %v370_v11 = vld [vmem:[#allocation7 + $0x160] sm:$0xff] }
  0x67   :  { %539 = vmatpush1.msra.mxu0 %v356_v13  ;;  %v361_v13 = vld [vmem:[#allocation7 + $0x118] sm:$0xff] }
  0x68   :  { %540 = vmatprep.subr.mxu0 %v347_v15  ;;  %v360_v15 = vld [vmem:[#allocation7 + $0x110] sm:$0xff] }
  0x69   :  { %541 = vmatpush1.msra.mxu0 %v346_v17  ;;  %v351_v17 = vld [vmem:[#allocation7 + $0xc8] sm:$0xff] }
  0x6a   :  { %542 = vmatprep.subr.mxu0 %v337_v19  ;;  %v350_v19 = vld [vmem:[#allocation7 + $0xc0] sm:$0xff] }
  0x6b   :  { %543 = vmatpush1.msra.mxu0 %v336_v21  ;;  %v341_v21 = vld [vmem:[#allocation7 + $0x78] sm:$0xff] }
  0x6c   :  { %544 = vmatprep.subr.mxu0 %v327_v23  ;;  %v340_v23 = vld [vmem:[#allocation7 + $0x70] sm:$0xff] }
 0x110   :  { %v189_v26 = vpop.f32.mrf.mxu0 }
 0x111   :  { %v200_v28 = vmul.f32 %v1871_v25, %v189_v26  ;;  %v326_v25 = vld [vmem:[#allocation7] sm:$0xff]  ;;  %v328_v26 = vld [vmem:[#allocation7 + $0x10] sm:$0xff] }
 0x112   :  { %v1946_v29 = vpop.f32.mrf.mxu0  ;;  %545 = vmatpush1.msra.mxu0 %v326_v25  ;;  %v331_v25 = vld [vmem:[#allocation7 + $0x28] sm:$0xff] }
 0x113   :  { %v208_v30 = vadd.f32 %v1872_v27, %v200_v28  ;;  %v461_v27 = vld [vmem:[#allocation7 + $0x438] sm:$0xff]  ;;  %v463_v28 = vld [vmem:[#allocation7 + $0x448] sm:$0xff] }
 0x114   :  { %659 = vmatprep.subr.mxu0 %v461_v27  ;;  %v1874_v29 = vld [vmem:[%s2595_s5] ss:$0 sm:$0xff]  ;;  %v330_v27 = vld [vmem:[#allocation7 + $0x20] sm:$0xff] }
 0x115   :  { %v209_v31 = vmax.f32 %v208_v30, 0.0 }
 0x117   :  { %211 = vrot.lane.b32.xlu0 %v209_v31, %s2214_s16 }
 0x189   :  { %v212_v32 = vpop.permute.xlu0 %211 }
 0x18a   :  { %v214_v33 = vmax.f32 %v209_v31, %v212_v32  ;;  %v1875_v31 = vld [vmem:[%s2596_s6] ss:$0 sm:$0xff] }
 0x18c   :  { %1978 = vmatmul.mubr.msk.f32.vlgmr.msra.gmra.mxu1 %vm230_vm2, %v214_v33 }
 0x18d   :  { %648 = vmatprep.mubr.f32.mxu1 %v2212_v0  ;;  %589 = vmatpush1.msra.mxu1 %v458_v37 }
 0x18e   :  { %590 = vmatprep.subr.mxu1 %v449_v39  ;;  %v462_v39 = vld [vmem:[#allocation7 + $0x440] sm:$0xff] }
 0x18f   :  { %591 = vmatpush1.msra.mxu1 %v448_v41  ;;  %v453_v41 = vld [vmem:[#allocation7 + $0x3f8] sm:$0xff] }
 0x190   :  { %592 = vmatprep.subr.mxu1 %v439_v43  ;;  %v452_v43 = vld [vmem:[#allocation7 + $0x3f0] sm:$0xff] }
 0x191   :  { %593 = vmatpush1.msra.mxu1 %v438_v45  ;;  %v443_v45 = vld [vmem:[#allocation7 + $0x3a8] sm:$0xff] }
 0x192   :  { %594 = vmatprep.subr.mxu1 %v429_v47  ;;  %v442_v47 = vld [vmem:[#allocation7 + $0x3a0] sm:$0xff] }
 0x193   :  { %595 = vmatpush1.msra.mxu1 %v428_v49  ;;  %v433_v49 = vld [vmem:[#allocation7 + $0x358] sm:$0xff] }
 0x194   :  { %596 = vmatprep.subr.mxu1 %v419_v51  ;;  %v432_v51 = vld [vmem:[#allocation7 + $0x350] sm:$0xff] }
 0x195   :  { %597 = vmatpush1.msra.mxu1 %v418_v53  ;;  %v423_v53 = vld [vmem:[#allocation7 + $0x308] sm:$0xff] }
 0x196   :  { %598 = vmatprep.subr.mxu1 %v409_v55  ;;  %v422_v55 = vld [vmem:[#allocation7 + $0x300] sm:$0xff] }
 0x197   :  { %599 = vmatpush1.msra.mxu1 %v408_v57  ;;  %v413_v57 = vld [vmem:[#allocation7 + $0x2b8] sm:$0xff] }
 0x198   :  { %600 = vmatprep.subr.mxu1 %v399_v59  ;;  %v412_v59 = vld [vmem:[#allocation7 + $0x2b0] sm:$0xff] }
 0x199   :  { %601 = vmatpush1.msra.mxu1 %v398_v61  ;;  %v403_v61 = vld [vmem:[#allocation7 + $0x268] sm:$0xff] }
 0x19a   :  { %602 = vmatprep.subr.mxu1 %v389_v63  ;;  %v402_v63 = vld [vmem:[#allocation7 + $0x260] sm:$0xff] }
 0x19b   :  { %603 = vmatpush1.msra.mxu1 %v388_v2  ;;  %v393_v2 = vld [vmem:[#allocation7 + $0x218] sm:$0xff] }
 0x19c   :  { %604 = vmatprep.subr.mxu1 %v379_v4  ;;  %v392_v4 = vld [vmem:[#allocation7 + $0x210] sm:$0xff] }
 0x19d   :  { %605 = vmatpush1.msra.mxu1 %v378_v6  ;;  %v383_v6 = vld [vmem:[#allocation7 + $0x1c8] sm:$0xff] }
 0x19e   :  { %606 = vmatprep.subr.mxu1 %v369_v8  ;;  %v382_v8 = vld [vmem:[#allocation7 + $0x1c0] sm:$0xff] }
 0x19f   :  { %607 = vmatpush1.msra.mxu1 %v368_v10  ;;  %v373_v10 = vld [vmem:[#allocation7 + $0x178] sm:$0xff] }
 0x1a0   :  { %608 = vmatprep.subr.mxu1 %v359_v12  ;;  %v372_v12 = vld [vmem:[#allocation7 + $0x170] sm:$0xff] }
 0x1a1   :  { %609 = vmatpush1.msra.mxu1 %v358_v14  ;;  %v363_v14 = vld [vmem:[#allocation7 + $0x128] sm:$0xff] }
 0x1a2   :  { %610 = vmatprep.subr.mxu1 %v349_v16  ;;  %v362_v16 = vld [vmem:[#allocation7 + $0x120] sm:$0xff] }
 0x1a3   :  { %611 = vmatpush1.msra.mxu1 %v348_v18  ;;  %v353_v18 = vld [vmem:[#allocation7 + $0xd8] sm:$0xff] }
 0x1a4   :  { %612 = vmatprep.subr.mxu1 %v339_v20  ;;  %v352_v20 = vld [vmem:[#allocation7 + $0xd0] sm:$0xff] }
 0x1a5   :  { %613 = vmatpush1.msra.mxu1 %v338_v22  ;;  %v343_v22 = vld [vmem:[#allocation7 + $0x88] sm:$0xff] }
 0x1a6   :  { %614 = vmatprep.subr.mxu1 %v329_v24  ;;  %v342_v24 = vld [vmem:[#allocation7 + $0x80] sm:$0xff] }
 0x1a7   :  { %615 = vmatpush1.msra.mxu1 %v328_v26  ;;  %v333_v26 = vld [vmem:[#allocation7 + $0x38] sm:$0xff] }
 0x1a8   :  { %730 = vmatprep.subr.mxu1 %v463_v28  ;;  %v332_v28 = vld [vmem:[#allocation7 + $0x30] sm:$0xff] }
 0x24c   :  { %v300_v30 = vpop.f32.mrf.mxu1 }
 0x24d   :  { %v311_v32 = vmul.f32 %v1874_v29, %v300_v30  ;;  %v465_v29 = vld [vmem:[#allocation7 + $0x458] sm:$0xff] }
 0x24e   :  { %v1979_v33 = vpop.f32.mrf.mxu1  ;;  %v2359_v30 = vld [vmem:[#allocation8 + $0x38] sm:$0xff] }
 0x24f   :  { %v319_v34 = vadd.f32 %v1875_v31, %v311_v32  ;;  %v464_v31 = vld [vmem:[#allocation7 + $0x450] sm:$0xff]  ;;  %v455_v33 = vld [vmem:[#allocation7 + $0x408] sm:$0xff] }
 0x250   :  { %v2362_v32 = vld [vmem:[#allocation8 + $0x30] sm:$0xff] }
 0x251   :  { %v320_v35 = vmax.f32 %v319_v34, 0.0  ;;  %v2368_v34 = vld [vmem:[#allocation8 + $0x28] sm:$0xff] }
 0x253   :  { %322 = vrot.lane.b32.xlu0 %v320_v35, %s2215_s19 }
 0x2c5   :  { %v323_v36 = vpop.permute.xlu0 %322 }
 0x2c6   :  { %v2352_v37 = vmax.f32 %v320_v35, %v323_v36  ;;  %v454_v35 = vld [vmem:[#allocation7 + $0x400] sm:$0xff] }
 0x2c7   :  { %v2371_v36 = vld [vmem:[#allocation8 + $0x20] sm:$0xff] }
 0x2c8   :  { %1876 = vmatmul.mubr.msk.f32.vlgmr.msra.gmra.mxu0 %vm510_vm3, %v2352_v37  ;;  %1877 = vmatmul.mubr.msk.f32.vlgmr.msra.gmra.mxu1 %vm510_vm3, %v2352_v37 }
 0x2c9   :  { %660 = vmatpush1.msra.mxu0 %v460_v38  ;;  %731 = vmatpush1.msra.mxu1 %v462_v39  ;;  %v445_v38 = vld [vmem:[#allocation7 + $0x3b8] sm:$0xff] }
 0x2ca   :  { %661 = vmatprep.subr.mxu0 %v451_v40  ;;  %732 = vmatprep.subr.mxu1 %v453_v41  ;;  %v2374_v39 = vld [vmem:[#allocation8 + $0x18] sm:$0xff]  ;;  %v444_v40 = vld [vmem:[#allocation7 + $0x3b0] sm:$0xff] }
 0x2cb   :  { %662 = vmatpush1.msra.mxu0 %v450_v42  ;;  %733 = vmatpush1.msra.mxu1 %v452_v43  ;;  %v2377_v41 = vld [vmem:[#allocation8 + $0x10] sm:$0xff]  ;;  %v435_v42 = vld [vmem:[#allocation7 + $0x368] sm:$0xff] }
 0x2cc   :  { %663 = vmatprep.subr.mxu0 %v441_v44  ;;  %734 = vmatprep.subr.mxu1 %v443_v45  ;;  %v2380_v43 = vld [vmem:[#allocation8 + $0x8] sm:$0xff]  ;;  %v434_v44 = vld [vmem:[#allocation7 + $0x360] sm:$0xff] }
 0x2cd   :  { %664 = vmatpush1.msra.mxu0 %v440_v46  ;;  %735 = vmatpush1.msra.mxu1 %v442_v47  ;;  %v2383_v45 = vld [vmem:[#allocation8] sm:$0xff]  ;;  %v425_v46 = vld [vmem:[#allocation7 + $0x318] sm:$0xff] }
 0x2ce   :  { %665 = vmatprep.subr.mxu0 %v431_v48  ;;  %736 = vmatprep.subr.mxu1 %v433_v49  ;;  %v2387_v47 = vld [vmem:[#allocation8 + $0x78] sm:$0xff]  ;;  %v424_v48 = vld [vmem:[#allocation7 + $0x310] sm:$0xff] }
 0x2cf   :  { %666 = vmatpush1.msra.mxu0 %v430_v50  ;;  %737 = vmatpush1.msra.mxu1 %v432_v51  ;;  %v2390_v49 = vld [vmem:[#allocation8 + $0x70] sm:$0xff]  ;;  %v415_v50 = vld [vmem:[#allocation7 + $0x2c8] sm:$0xff] }
 0x2d0   :  { %667 = vmatprep.subr.mxu0 %v421_v52  ;;  %738 = vmatprep.subr.mxu1 %v423_v53  ;;  %v2393_v51 = vld [vmem:[#allocation8 + $0x68] sm:$0xff]  ;;  %v414_v52 = vld [vmem:[#allocation7 + $0x2c0] sm:$0xff] }
 0x2d1   :  { %668 = vmatpush1.msra.mxu0 %v420_v54  ;;  %739 = vmatpush1.msra.mxu1 %v422_v55  ;;  %v2397_v53 = vld [vmem:[#allocation8 + $0x60] sm:$0xff]  ;;  %v405_v54 = vld [vmem:[#allocation7 + $0x278] sm:$0xff] }
 0x2d2   :  { %669 = vmatprep.subr.mxu0 %v411_v56  ;;  %740 = vmatprep.subr.mxu1 %v413_v57  ;;  %v2400_v55 = vld [vmem:[#allocation8 + $0x58] sm:$0xff]  ;;  %v404_v56 = vld [vmem:[#allocation7 + $0x270] sm:$0xff] }
 0x2d3   :  { %670 = vmatpush1.msra.mxu0 %v410_v58  ;;  %741 = vmatpush1.msra.mxu1 %v412_v59  ;;  %v2403_v57 = vld [vmem:[#allocation8 + $0x50] sm:$0xff]  ;;  %v395_v58 = vld [vmem:[#allocation7 + $0x228] sm:$0xff] }
 0x2d4   :  { %671 = vmatprep.subr.mxu0 %v401_v60  ;;  %742 = vmatprep.subr.mxu1 %v403_v61  ;;  %v2406_v59 = vld [vmem:[#allocation8 + $0x48] sm:$0xff]  ;;  %v394_v60 = vld [vmem:[#allocation7 + $0x220] sm:$0xff] }
 0x2d5   :  { %672 = vmatpush1.msra.mxu0 %v400_v62  ;;  %743 = vmatpush1.msra.mxu1 %v402_v63  ;;  %v2409_v61 = vld [vmem:[#allocation8 + $0x40] sm:$0xff]  ;;  %v385_v62 = vld [vmem:[#allocation7 + $0x1d8] sm:$0xff]  ;;  %v384_v63 = vld [vmem:[#allocation7 + $0x1d0] sm:$0xff] }
 0x2d6   :  { %673 = vmatprep.subr.mxu0 %v391_v1  ;;  %744 = vmatprep.subr.mxu1 %v393_v2  ;;  %v375_v1 = vld [vmem:[#allocation7 + $0x188] sm:$0xff]  ;;  %v374_v2 = vld [vmem:[#allocation7 + $0x180] sm:$0xff] }
 0x2d7   :  { %674 = vmatpush1.msra.mxu0 %v390_v3  ;;  %745 = vmatpush1.msra.mxu1 %v392_v4  ;;  %v365_v3 = vld [vmem:[#allocation7 + $0x138] sm:$0xff]  ;;  %v364_v4 = vld [vmem:[#allocation7 + $0x130] sm:$0xff] }
 0x2d8   :  { %675 = vmatprep.subr.mxu0 %v381_v5  ;;  %746 = vmatprep.subr.mxu1 %v383_v6  ;;  %v355_v5 = vld [vmem:[#allocation7 + $0xe8] sm:$0xff]  ;;  %v354_v6 = vld [vmem:[#allocation7 + $0xe0] sm:$0xff] }
 0x2d9   :  { %676 = vmatpush1.msra.mxu0 %v380_v7  ;;  %747 = vmatpush1.msra.mxu1 %v382_v8  ;;  %v345_v7 = vld [vmem:[#allocation7 + $0x98] sm:$0xff]  ;;  %v344_v8 = vld [vmem:[#allocation7 + $0x90] sm:$0xff] }
 0x2da   :  { %677 = vmatprep.subr.mxu0 %v371_v9  ;;  %748 = vmatprep.subr.mxu1 %v373_v10  ;;  %v335_v9 = vld [vmem:[#allocation7 + $0x48] sm:$0xff]  ;;  %v334_v10 = vld [vmem:[#allocation7 + $0x40] sm:$0xff] }
 0x2db   :  { %678 = vmatpush1.msra.mxu0 %v370_v11  ;;  %749 = vmatpush1.msra.mxu1 %v372_v12 }
 0x2dc   :  { %679 = vmatprep.subr.mxu0 %v361_v13  ;;  %750 = vmatprep.subr.mxu1 %v363_v14  ;;  %v470_v13 = vlaneseq }
 0x2dd   :  { %680 = vmatpush1.msra.mxu0 %v360_v15  ;;  %751 = vmatpush1.msra.mxu1 %v362_v16 }
 0x2de   :  { %681 = vmatprep.subr.mxu0 %v351_v17  ;;  %752 = vmatprep.subr.mxu1 %v353_v18  ;;  %v2439_v15 = vshrl.u32 %v470_v13, 7 }
 0x2df   :  { %682 = vmatpush1.msra.mxu0 %v350_v19  ;;  %753 = vmatpush1.msra.mxu1 %v352_v20  ;;  %v2449_v19 = vld [vmem:[%s2598_s8] sm:$0xff] }
 0x2e0   :  { %683 = vmatprep.subr.mxu0 %v341_v21  ;;  %754 = vmatprep.subr.mxu1 %v343_v22  ;;  %v472_v17 = vsub.s32 0, %v2439_v15 }
 0x2e1   :  { %684 = vmatpush1.msra.mxu0 %v340_v23  ;;  %755 = vmatpush1.msra.mxu1 %v342_v24 }
 0x2e2   :  { %685 = vmatprep.subr.mxu0 %v331_v25  ;;  %756 = vmatprep.subr.mxu1 %v333_v26  ;;  %v473_v21 = vrot.slane %v2449_v19, %v472_v17 }
 0x2e3   :  { %686 = vmatpush1.msra.mxu0 %v330_v27  ;;  %719 = vmatprep.mubr.f32.mxu0 %v2212_v0 }
 0x2e4   :  { %757 = vmatpush1.msra.mxu1 %v332_v28  ;;  %790 = vmatprep.mubr.f32.mxu1 %v2212_v0 }
 0x2e5   :  { %1878 = vmatmul.mubr.msk.f32.vlgmr.msra.gmra.mxu0 %vm510_vm3, %v2352_v37  ;;  %1879 = vmatmul.mubr.msk.f32.vlgmr.msra.gmra.mxu1 %vm510_vm3, %v2352_v37 }
 0x2e6   :  { %801 = vmatprep.subr.mxu0 %v465_v29  ;;  %911 = vmatprep.subr.mxu1 %v2359_v30 }
 0x2e7   :  { %802 = vmatpush1.msra.mxu0 %v464_v31  ;;  %912 = vmatpush1.msra.mxu1 %v2362_v32 }
 0x2e8   :  { %803 = vmatprep.subr.mxu0 %v455_v33  ;;  %913 = vmatprep.subr.mxu1 %v2368_v34 }
 0x2e9   :  { %804 = vmatpush1.msra.mxu0 %v454_v35  ;;  %914 = vmatpush1.msra.mxu1 %v2371_v36 }
 0x2ea   :  { %805 = vmatprep.subr.mxu0 %v445_v38  ;;  %915 = vmatprep.subr.mxu1 %v2374_v39 }
 0x2eb   :  { %806 = vmatpush1.msra.mxu0 %v444_v40  ;;  %916 = vmatpush1.msra.mxu1 %v2377_v41 }
 0x2ec   :  { %807 = vmatprep.subr.mxu0 %v435_v42  ;;  %917 = vmatprep.subr.mxu1 %v2380_v43 }
 0x2ed   :  { %808 = vmatpush1.msra.mxu0 %v434_v44  ;;  %918 = vmatpush1.msra.mxu1 %v2383_v45 }
 0x2ee   :  { %951 = vmatprep.mubr.f32.mxu1 %v2212_v0  ;;  %809 = vmatprep.subr.mxu0 %v425_v46 }
 0x2ef   :  { %952 = vmatmul.mubr.f32.vlgmr.msra.gmra.mxu1 %v2212_v0  ;;  %982 = vmatprep.subr.mxu1 %v2387_v47 }
 0x2f0   :  { %810 = vmatpush1.msra.mxu0 %v424_v48  ;;  %983 = vmatpush1.msra.mxu1 %v2390_v49 }
 0x2f1   :  { %811 = vmatprep.subr.mxu0 %v415_v50  ;;  %984 = vmatprep.subr.mxu1 %v2393_v51 }
 0x2f2   :  { %812 = vmatpush1.msra.mxu0 %v414_v52  ;;  %985 = vmatpush1.msra.mxu1 %v2397_v53 }
 0x2f3   :  { %813 = vmatprep.subr.mxu0 %v405_v54  ;;  %986 = vmatprep.subr.mxu1 %v2400_v55 }
 0x2f4   :  { %814 = vmatpush1.msra.mxu0 %v404_v56  ;;  %987 = vmatpush1.msra.mxu1 %v2403_v57 }
 0x2f5   :  { %815 = vmatprep.subr.mxu0 %v395_v58  ;;  %988 = vmatprep.subr.mxu1 %v2406_v59 }
 0x2f6   :  { %816 = vmatpush1.msra.mxu0 %v394_v60  ;;  %989 = vmatpush1.msra.mxu1 %v2409_v61  ;;  %v476_v60 = vsub.s32 2, %v2439_v15 }
 0x2f7   :  { %1022 = vmatprep.mubr.f32.mxu1 %v2212_v0  ;;  %817 = vmatprep.subr.mxu0 %v385_v62  ;;  %v480_v62 = vsub.s32 3, %v2439_v15 }
 0x2f8   :  { %1023 = vmatmul.mubr.f32.vlgmr.msra.gmra.mxu1 %v2212_v0  ;;  %818 = vmatpush1.msra.mxu0 %v384_v63  ;;  %v477_v63 = vrot.slane %v2449_v19, %v476_v60 }
 0x2f9   :  { %819 = vmatprep.subr.mxu0 %v375_v1  ;;  %861 = vmatprep.mubr.f32.mxu0 %v2212_v0  ;;  %v481_v1 = vrot.slane %v2449_v19, %v480_v62  ;;  %v484_v62 = vsub.s32 4, %v2439_v15 }
 0x2fa   :  { %820 = vmatpush1.msra.mxu0 %v374_v2  ;;  %1211 = vmatprep.subr.mxu1 %v2359_v30 }
 0x2fb   :  { %821 = vmatprep.subr.mxu0 %v365_v3  ;;  %1212 = vmatpush1.msra.mxu1 %v2362_v32 }
 0x2fc   :  { %822 = vmatpush1.msra.mxu0 %v364_v4  ;;  %1213 = vmatprep.subr.mxu1 %v2368_v34 }
 0x2fd   :  { %823 = vmatprep.subr.mxu0 %v355_v5  ;;  %1214 = vmatpush1.msra.mxu1 %v2371_v36 }
 0x2fe   :  { %824 = vmatpush1.msra.mxu0 %v354_v6  ;;  %1215 = vmatprep.subr.mxu1 %v2374_v39 }
 0x2ff   :  { %825 = vmatprep.subr.mxu0 %v345_v7  ;;  %1216 = vmatpush1.msra.mxu1 %v2377_v41 }
 0x300   :  { %826 = vmatpush1.msra.mxu0 %v344_v8  ;;  %1217 = vmatprep.subr.mxu1 %v2380_v43 }
 0x301   :  { %827 = vmatprep.subr.mxu0 %v335_v9  ;;  %1218 = vmatpush1.msra.mxu1 %v2383_v45 }
 0x302   :  { %828 = vmatpush1.msra.mxu0 %v334_v10  ;;  %1251 = vmatprep.mubr.f32.mxu1 %v2212_v0 }
 0x303   :  { %1880 = vmatmul.mubr.msk.f32.vlgmr.msra.gmra.mxu0 %vm510_vm3, %v2352_v37  ;;  %1083 = vmatprep.subr.mxu0 %v2359_v30 }
 0x304   :  { %1084 = vmatpush1.msra.mxu0 %v2362_v32  ;;  %1123 = vmatprep.mubr.f32.mxu0 %v2212_v0 }
 0x305   :  { %1085 = vmatprep.subr.mxu0 %v2368_v34  ;;  %1415 = vmatprep.subr.mxu1 %v2359_v30 }
 0x306   :  { %1086 = vmatpush1.msra.mxu0 %v2371_v36 }
 0x307   :  { %1087 = vmatprep.subr.mxu0 %v2374_v39 }
 0x308   :  { %1088 = vmatpush1.msra.mxu0 %v2377_v41 }
 0x309   :  { %1089 = vmatprep.subr.mxu0 %v2380_v43 }
 0x30a   :  { %1090 = vmatpush1.msra.mxu0 %v2383_v45 }
 0x30b   :  { %1289 = vmatprep.subr.mxu0 %v2387_v47 }
 0x388   :  { %v580_v37 = vpop.f32.mrf.mxu0  ;;  %v650_v12 = vpop.f32.mrf.mxu1 }
 0x389   :  { %v581_v23 = vadd.f32 %v580_v37, %v473_v21  ;;  %v651_v3 = vadd.f32 %v650_v12, %v477_v63  ;;  %v488_v63 = vsub.s32 5, %v2439_v15 }
 0x38a   :  { %v582_v11 = vpop.f32.mrf.mxu0  ;;  %v652_v14 = vpop.f32.mrf.mxu1 }
 0x38b   :  { %v653_v5 = vadd.f32 %v652_v14, %v481_v1  ;;  %v485_v1 = vrot.slane %v2449_v19, %v484_v62 }
 0x3a5   :  { %v2441_v16 = vpop.f32.mrf.mxu1  ;;  %v2452_v27 = vpop.f32.mrf.mxu0 }
 0x3a7   :  { %v2444_v18 = vpop.f32.mrf.mxu1  ;;  %v2454_v28 = vpop.f32.mrf.mxu0 }
 0x3af   :  { %v953_v20 = vpop.f32.mrf.mxu1 }
 0x3b0   :  { %v957_v24 = vadd.f32 %v953_v20, %v581_v23 }
 0x3b1   :  { %v955_v22 = vpop.f32.mrf.mxu1 }
 0x3b8   :  { %v1024_v25 = vpop.f32.mrf.mxu1 }
 0x3b9   :  { %v1029_v26 = vadd.f32 %v1024_v25, %v957_v24 }
 0x3ba   :  { %v1026_v10 = vpop.f32.mrf.mxu1 }
 0x3bb   :  { %2009 = vtanh.f32 %v1029_v26  ;;  %v1881_v33 = vmul.f32 -1.442695, %v1029_v26 }
 0x3bd   :  { %2011 = vpow2.f32 %v1881_v33 }
 0x3c3   :  { %v863_v29 = vpop.f32.mrf.mxu0 }
 0x3c5   :  { %v2474_v2 = vpop.f32.mrf.mxu0 }
 0x3c8   :  { %v2010_v31 = vpop.eup %2009 }
 0x3c9   :  { %1039 = vrot.lane.b32.xlu1 %v2010_v31, %s2216_s20 }
 0x3ca   :  { %v2012_v35 = vpop.eup %2011 }
 0x3cb   :  { %v1033_v38 = vadd.f32 1.0, %v2012_v35 }
 0x3cd   :  { %2013 = vrcp.f32 %v1033_v38 }
 0x3da   :  { %v2014_v40 = vpop.eup %2013 }
 0x3db   :  { %v1037_v46 = vmul.f32 0.0, %v2014_v40 }
 0x43b   :  { %v1040_v42 = vpop.permute.xlu1 %1039 }
 0x43c   :  { %v1042_v44 = vmul.f32 %v2014_v40, %v1040_v42 }
 0x43e   :  { %1044 = vrot.lane.b32.xlu1 %v1042_v44, %s2217_s4 }
 0x4b0   :  { %v1045_v48 = vpop.permute.xlu1 %1044 }
 0x4b1   :  { %v1047_v50 = vadd.f32 %v1045_v48, %v1037_v46 }
 0x4b3   :  { %2015 = vtanh.f32 %v1047_v50 }
 0x4c0   :  { %v2016_v52 = vpop.eup %2015 }
 0x4c1   :  { %1050 = vrot.lane.b32.xlu0 %v2016_v52, %s2216_s20 }
 0x533   :  { %v1051_v54 = vpop.permute.xlu0 %1050 }
 0x534   :  { %v1053_v56 = vmul.f32 %v2014_v40, %v1051_v54 }
 0x536   :  { %1055 = vrot.lane.b32.xlu1 %v1053_v56, %s2217_s4 }
 0x5a8   :  { %v1056_v58 = vpop.permute.xlu1 %1055 }
 0x5a9   :  { %1882 = vmatmul.mubr.msk.f32.vlgmr.msra.gmra.mxu0 %vm883_vm4, %v1056_v58 }
 0x5aa   :  { %1290 = vmatpush1.msra.mxu0 %v2390_v49  ;;  %1329 = vmatprep.mubr.f32.mxu0 %v2212_v0 }
 0x5ab   :  { %1291 = vmatprep.subr.mxu0 %v2393_v51 }
 0x5ac   :  { %1292 = vmatpush1.msra.mxu0 %v2397_v53 }
 0x5ad   :  { %1293 = vmatprep.subr.mxu0 %v2400_v55 }
 0x5ae   :  { %1294 = vmatpush1.msra.mxu0 %v2403_v57 }
 0x5af   :  { %1295 = vmatprep.subr.mxu0 %v2406_v59 }
 0x5b0   :  { %1296 = vmatpush1.msra.mxu0 %v2409_v61 }
 0x5b1   :  { %1493 = vmatprep.subr.mxu0 %v2387_v47 }
 0x669   :  { %v1125_v4 = vpop.f32.mrf.mxu0 }
 0x66a   :  { %v1130_v6 = vadd.f32 %v1125_v4, %v651_v3  ;;  %v489_v3 = vrot.slane %v2449_v19, %v488_v63  ;;  %v722_v4 = vadd.f32 %v2452_v27, %v485_v1 }
 0x66b   :  { %v1127_v7 = vpop.f32.mrf.mxu0 }
 0x66c   :  { %v1132_v8 = vadd.f32 %v1130_v6, %v1024_v25  ;;  %v1131_v9 = vadd.f32 %v1127_v7, %v653_v5  ;;  %v724_v6 = vadd.f32 %v2454_v28, %v489_v3 }
 0x66e   :  { %2017 = vtanh.f32 %v1132_v8  ;;  %v1133_v37 = vadd.f32 %v1131_v9, %v1026_v10  ;;  %v1883_v17 = vmul.f32 -1.442695, %v1132_v8 }
 0x670   :  { %2019 = vtanh.f32 %v1133_v37  ;;  %v1884_v20 = vmul.f32 -1.442695, %v1133_v37 }
 0x671   :  { %2021 = vpow2.f32 %v1883_v17 }
 0x672   :  { %2023 = vpow2.f32 %v1884_v20 }
 0x67b   :  { %v2018_v11 = vpop.eup %2017 }
 0x67c   :  { %1150 = vrot.lane.b32.xlu0 %v2018_v11, %s2216_s20 }
 0x67d   :  { %v2020_v13 = vpop.eup %2019 }
 0x67e   :  { %1167 = vrot.lane.b32.xlu1 %v2020_v13, %s2216_s20  ;;  %v2022_v12 = vpop.eup %2021 }
 0x67f   :  { %v2024_v14 = vpop.eup %2023  ;;  %v1140_v21 = vadd.f32 1.0, %v2022_v12 }
 0x680   :  { %v1141_v22 = vadd.f32 1.0, %v2024_v14 }
 0x681   :  { %2025 = vrcp.f32 %v1140_v21 }
 0x682   :  { %2027 = vrcp.f32 %v1141_v22 }
 0x68e   :  { %v2026_v23 = vpop.eup %2025 }
 0x68f   :  { %v2028_v26 = vpop.eup %2027  ;;  %v1148_v33 = vmul.f32 %v2026_v23, %v1047_v50 }
 0x690   :  { %v1165_v40 = vmul.f32 0.0, %v2028_v26 }
 0x6ee   :  { %v1151_v24 = vpop.permute.xlu0 %1150 }
 0x6ef   :  { %v1153_v25 = vmul.f32 %v2026_v23, %v1151_v24 }
 0x6f0   :  { %v1168_v29 = vpop.permute.xlu1 %1167 }
 0x6f1   :  { %1155 = vrot.lane.b32.xlu0 %v1153_v25, %s2217_s4  ;;  %v1170_v31 = vmul.f32 %v2028_v26, %v1168_v29 }
 0x6f3   :  { %1172 = vrot.lane.b32.xlu1 %v1170_v31, %s2217_s4 }
 0x763   :  { %v1156_v35 = vpop.permute.xlu0 %1155 }
 0x764   :  { %v2480_v38 = vadd.f32 %v1156_v35, %v1148_v33 }
 0x765   :  { %v1173_v42 = vpop.permute.xlu1 %1172 }
 0x766   :  { %2029 = vtanh.f32 %v2480_v38  ;;  %v2483_v44 = vadd.f32 %v1173_v42, %v1165_v40 }
 0x768   :  { %2031 = vtanh.f32 %v2483_v44 }
 0x773   :  { %v2030_v46 = vpop.eup %2029 }
 0x774   :  { %1161 = vrot.lane.b32.xlu0 %v2030_v46, %s2216_s20 }
 0x775   :  { %v2032_v48 = vpop.eup %2031 }
 0x776   :  { %1178 = vrot.lane.b32.xlu1 %v2032_v48, %s2216_s20 }
 0x7e6   :  { %v1162_v52 = vpop.permute.xlu0 %1161 }
 0x7e7   :  { %v1164_v54 = vmul.f32 %v2026_v23, %v1162_v52 }
 0x7e8   :  { %v1179_v50 = vpop.permute.xlu1 %1178 }
 0x7e9   :  { %1183 = vrot.lane.b32.xlu0 %v1164_v54, %s2217_s4  ;;  %v1181_v56 = vmul.f32 %v2028_v26, %v1179_v50 }
 0x7eb   :  { %1261 = vrot.lane.b32.xlu1 %v1181_v56, %s2217_s4 }
 0x85b   :  { %v1184_v58 = vpop.permute.xlu0 %1183 }
 0x85c   :  { %1885 = vmatmul.mubr.msk.f32.vlgmr.msra.gmra.mxu1 %vm883_vm4, %v1184_v58 }
 0x85d   :  { %1416 = vmatpush1.msra.mxu1 %v2362_v32  ;;  %1455 = vmatprep.mubr.f32.mxu1 %v2212_v0  ;;  %v1262_v60 = vpop.permute.xlu1 %1261 }
 0x85e   :  { %1417 = vmatprep.subr.mxu1 %v2368_v34  ;;  %1886 = vmatmul.mubr.msk.f32.vlgmr.msra.gmra.mxu0 %vm883_vm4, %v1262_v60 }
 0x85f   :  { %1418 = vmatpush1.msra.mxu1 %v2371_v36  ;;  %1494 = vmatpush1.msra.mxu0 %v2390_v49 }
 0x860   :  { %1419 = vmatprep.subr.mxu1 %v2374_v39  ;;  %1495 = vmatprep.subr.mxu0 %v2393_v51 }
 0x861   :  { %1420 = vmatpush1.msra.mxu1 %v2377_v41  ;;  %1496 = vmatpush1.msra.mxu0 %v2397_v53 }
 0x862   :  { %1421 = vmatprep.subr.mxu1 %v2380_v43  ;;  %1497 = vmatprep.subr.mxu0 %v2400_v55 }
 0x863   :  { %1422 = vmatpush1.msra.mxu1 %v2383_v45  ;;  %1498 = vmatpush1.msra.mxu0 %v2403_v57 }
 0x864   :  { %1533 = vmatprep.mubr.f32.mxu0 %v2212_v0  ;;  %1499 = vmatprep.subr.mxu0 %v2406_v59 }
 0x865   :  { %1619 = vmatprep.subr.mxu1 %v2359_v30  ;;  %1500 = vmatpush1.msra.mxu0 %v2409_v61 }
 0x866   :  { %1695 = vmatprep.subr.mxu0 %v2387_v47 }
 0x91c   :  { %v1253_v5 = vpop.f32.mrf.mxu1 }
 0x91d   :  { %v1258_v7 = vadd.f32 %v1253_v5, %v722_v4 }
 0x91e   :  { %v1255_v8 = vpop.f32.mrf.mxu1  ;;  %v1331_v9 = vpop.f32.mrf.mxu0 }
 0x91f   :  { %v1259_v30 = vadd.f32 %v1255_v8, %v724_v6  ;;  %v1336_v10 = vadd.f32 %v1331_v9, %v1258_v7 }
 0x920   :  { %v1333_v37 = vpop.f32.mrf.mxu0 }
 0x921   :  { %2033 = vtanh.f32 %v1336_v10  ;;  %v1337_v47 = vadd.f32 %v1333_v37, %v1259_v30  ;;  %v1887_v17 = vmul.f32 -1.442695, %v1336_v10 }
 0x923   :  { %2035 = vtanh.f32 %v1337_v47  ;;  %v1888_v27 = vmul.f32 -1.442695, %v1337_v47 }
 0x924   :  { %2037 = vpow2.f32 %v1887_v17 }
 0x925   :  { %2039 = vpow2.f32 %v1888_v27 }
 0x92e   :  { %v2034_v11 = vpop.eup %2033 }
 0x92f   :  { %1354 = vrot.lane.b32.xlu0 %v2034_v11, %s2216_s20 }
 0x930   :  { %v2036_v13 = vpop.eup %2035 }
 0x931   :  { %1371 = vrot.lane.b32.xlu1 %v2036_v13, %s2216_s20  ;;  %v2038_v28 = vpop.eup %2037 }
 0x932   :  { %v2040_v20 = vpop.eup %2039  ;;  %v1344_v12 = vadd.f32 1.0, %v2038_v28 }
 0x933   :  { %v1345_v14 = vadd.f32 1.0, %v2040_v20 }
 0x934   :  { %2041 = vrcp.f32 %v1344_v12 }
 0x935   :  { %2043 = vrcp.f32 %v1345_v14 }
 0x941   :  { %v2042_v21 = vpop.eup %2041 }
 0x942   :  { %v2044_v24 = vpop.eup %2043  ;;  %v1352_v29 = vmul.f32 %v2042_v21, %v2480_v38 }
 0x943   :  { %v1369_v35 = vmul.f32 %v2044_v24, %v2483_v44 }
 0x9a1   :  { %v1355_v22 = vpop.permute.xlu0 %1354 }
 0x9a2   :  { %v1357_v23 = vmul.f32 %v2042_v21, %v1355_v22  ;;  %v500_v22 = vsub.s32 1, %v2439_v15 }
 0x9a3   :  { %v1372_v25 = vpop.permute.xlu1 %1371 }
 0x9a4   :  { %1359 = vrot.lane.b32.xlu0 %v1357_v23, %s2217_s4  ;;  %v1374_v26 = vmul.f32 %v2044_v24, %v1372_v25  ;;  %v467_v23 = vld [vmem:[%s2598_s8 + $0x8] sm:$0x3] }
 0x9a6   :  { %1376 = vrot.lane.b32.xlu1 %v1374_v26, %s2217_s4 }
 0xa16   :  { %v1360_v31 = vpop.permute.xlu0 %1359 }
 0xa17   :  { %v2521_v33 = vadd.f32 %v1360_v31, %v1352_v29 }
 0xa18   :  { %v1377_v40 = vpop.permute.xlu1 %1376 }
 0xa19   :  { %2045 = vtanh.f32 %v2521_v33  ;;  %v2525_v42 = vadd.f32 %v1377_v40, %v1369_v35 }
 0xa1b   :  { %2047 = vtanh.f32 %v2525_v42 }
 0xa26   :  { %v2046_v46 = vpop.eup %2045 }
 0xa27   :  { %1365 = vrot.lane.b32.xlu0 %v2046_v46, %s2216_s20 }
 0xa28   :  { %v2048_v48 = vpop.eup %2047 }
 0xa29   :  { %1382 = vrot.lane.b32.xlu1 %v2048_v48, %s2216_s20 }
 0xa99   :  { %v1366_v52 = vpop.permute.xlu0 %1365 }
 0xa9a   :  { %v1368_v38 = vmul.f32 %v2042_v21, %v1366_v52 }
 0xa9b   :  { %v1383_v54 = vpop.permute.xlu1 %1382 }
 0xa9c   :  { %1387 = vrot.lane.b32.xlu0 %v1368_v38, %s2217_s4  ;;  %v1385_v50 = vmul.f32 %v2044_v24, %v1383_v54  ;;  %v501_v24 = vrot.slane %v467_v23, %v500_v22 }
 0xa9e   :  { %1465 = vrot.lane.b32.xlu1 %v1385_v50, %s2217_s4  ;;  %v865_v26 = vadd.f32 %v2474_v2, %v501_v24 }
 0xb0e   :  { %v1388_v44 = vpop.permute.xlu0 %1387 }
 0xb0f   :  { %1889 = vmatmul.mubr.msk.f32.vlgmr.msra.gmra.mxu1 %vm883_vm4, %v1388_v44 }
 0xb10   :  { %1620 = vmatpush1.msra.mxu1 %v2362_v32  ;;  %1659 = vmatprep.mubr.f32.mxu1 %v2212_v0  ;;  %v1466_v56 = vpop.permute.xlu1 %1465  ;;  %v492_v32 = vsub.s32 6, %v2439_v15 }
 0xb11   :  { %1621 = vmatprep.subr.mxu1 %v2368_v34  ;;  %1890 = vmatmul.mubr.msk.f32.vlgmr.msra.gmra.mxu0 %vm883_vm4, %v1466_v56  ;;  %v496_v34 = vsub.s32 7, %v2439_v15  ;;  %v1769_v56 = vld [vmem:[#allocation10 + $0x18] sm:$0xff] }
 0xb12   :  { %1622 = vmatpush1.msra.mxu1 %v2371_v36  ;;  %1696 = vmatpush1.msra.mxu0 %v2390_v49  ;;  %v493_v36 = vrot.slane %v2449_v19, %v492_v32  ;;  %v1768_v32 = vld [vmem:[#allocation10 + $0x10] sm:$0xff] }
 0xb13   :  { %1623 = vmatprep.subr.mxu1 %v2374_v39  ;;  %1697 = vmatprep.subr.mxu0 %v2393_v51  ;;  %v497_v39 = vrot.slane %v2449_v19, %v496_v34  ;;  %v1767_v34 = vld [vmem:[#allocation10 + $0x8] sm:$0xff] }
 0xb14   :  { %1624 = vmatpush1.msra.mxu1 %v2377_v41  ;;  %1698 = vmatpush1.msra.mxu0 %v2397_v53  ;;  %v793_v41 = vadd.f32 %v2441_v16, %v493_v36  ;;  %v1766_v36 = vld [vmem:[#allocation10] sm:$0xff] }
 0xb15   :  { %1625 = vmatprep.subr.mxu1 %v2380_v43  ;;  %1699 = vmatprep.subr.mxu0 %v2400_v55 }
 0xb16   :  { %1626 = vmatpush1.msra.mxu1 %v2383_v45  ;;  %1700 = vmatpush1.msra.mxu0 %v2403_v57  ;;  %v795_v45 = vadd.f32 %v2444_v18, %v497_v39 }
 0xb17   :  { %1735 = vmatprep.mubr.f32.mxu0 %v2212_v0  ;;  %1701 = vmatprep.subr.mxu0 %v2406_v59 }
 0xb18   :  { %1980 = vmatprep.subr.mxu1 %v2212_v0  ;;  %1702 = vmatpush1.msra.mxu0 %v2409_v61 }
 0xbcf   :  { %v1457_v43 = vpop.f32.mrf.mxu1 }
 0xbd0   :  { %v1462_v49 = vadd.f32 %v1457_v43, %v793_v41 }
 0xbd1   :  { %v1459_v51 = vpop.f32.mrf.mxu1  ;;  %v1535_v55 = vpop.f32.mrf.mxu0 }
 0xbd2   :  { %v1463_v53 = vadd.f32 %v1459_v51, %v795_v45  ;;  %v1540_v57 = vadd.f32 %v1535_v55, %v1462_v49  ;;  %v1896_v49 = vld [vmem:[%s2601_s11] ss:$0 sm:$0xff] }
 0xbd3   :  { %v1537_v59 = vpop.f32.mrf.mxu0 }
 0xbd4   :  { %2049 = vtanh.f32 %v1540_v57  ;;  %v1541_v61 = vadd.f32 %v1537_v59, %v1463_v53  ;;  %v1891_v19 = vmul.f32 -1.442695, %v1540_v57 }
 0xbd6   :  { %2051 = vtanh.f32 %v1541_v61  ;;  %v1892_v16 = vmul.f32 -1.442695, %v1541_v61 }
 0xbd7   :  { %2053 = vpow2.f32 %v1891_v19 }
 0xbd8   :  { %2055 = vpow2.f32 %v1892_v16 }
 0xbe1   :  { %v2050_v58 = vpop.eup %2049 }
 0xbe2   :  { %1558 = vrot.lane.b32.xlu0 %v2050_v58, %s2216_s20 }
 0xbe3   :  { %v2052_v60 = vpop.eup %2051 }
 0xbe4   :  { %1575 = vrot.lane.b32.xlu1 %v2052_v60, %s2216_s20  ;;  %v2054_v18 = vpop.eup %2053 }
 0xbe5   :  { %v2056_v62 = vpop.eup %2055  ;;  %v1548_v63 = vadd.f32 1.0, %v2054_v18 }
 0xbe6   :  { %v1549_v1 = vadd.f32 1.0, %v2056_v62 }
 0xbe7   :  { %2057 = vrcp.f32 %v1548_v63 }
 0xbe8   :  { %2059 = vrcp.f32 %v1549_v1 }
 0xbf4   :  { %v2058_v3 = vpop.eup %2057 }
 0xbf5   :  { %v2060_v6 = vpop.eup %2059  ;;  %v1556_v30 = vmul.f32 %v2058_v3, %v2521_v33 }
 0xbf6   :  { %v1573_v37 = vmul.f32 %v2060_v6, %v2525_v42 }
 0xc54   :  { %v1559_v4 = vpop.permute.xlu0 %1558 }
 0xc55   :  { %v1561_v5 = vmul.f32 %v2058_v3, %v1559_v4 }
 0xc56   :  { %v1576_v7 = vpop.permute.xlu1 %1575 }
 0xc57   :  { %1563 = vrot.lane.b32.xlu0 %v1561_v5, %s2217_s4  ;;  %v1578_v8 = vmul.f32 %v2060_v6, %v1576_v7 }
 0xc59   :  { %1580 = vrot.lane.b32.xlu1 %v1578_v8, %s2217_s4 }
 0xcc9   :  { %v1564_v9 = vpop.permute.xlu0 %1563 }
 0xcca   :  { %v1566_v10 = vadd.f32 %v1564_v9, %v1556_v30 }
 0xccb   :  { %v1581_v47 = vpop.permute.xlu1 %1580 }
 0xccc   :  { %2061 = vtanh.f32 %v1566_v10  ;;  %v1583_v11 = vadd.f32 %v1581_v47, %v1573_v37 }
 0xcce   :  { %2063 = vtanh.f32 %v1583_v11 }
 0xcd9   :  { %v2062_v13 = vpop.eup %2061 }
 0xcda   :  { %1569 = vrot.lane.b32.xlu0 %v2062_v13, %s2216_s20 }
 0xcdb   :  { %v2064_v17 = vpop.eup %2063 }
 0xcdc   :  { %1586 = vrot.lane.b32.xlu1 %v2064_v17, %s2216_s20 }
 0xd4c   :  { %v1570_v27 = vpop.permute.xlu0 %1569 }
 0xd4d   :  { %v1572_v28 = vmul.f32 %v2058_v3, %v1570_v27 }
 0xd4e   :  { %v1587_v20 = vpop.permute.xlu1 %1586 }
 0xd4f   :  { %1591 = vrot.lane.b32.xlu0 %v1572_v28, %s2217_s4  ;;  %v1589_v12 = vmul.f32 %v2060_v6, %v1587_v20 }
 0xd51   :  { %1667 = vrot.lane.b32.xlu1 %v1589_v12, %s2217_s4 }
 0xdc1   :  { %v1592_v14 = vpop.permute.xlu0 %1591 }
 0xdc2   :  { %1893 = vmatmul.mubr.msk.f32.vlgmr.msra.gmra.mxu1 %vm883_vm4, %v1592_v14 }
 0xdc3   :  { %1988 = vmatprep.mubr.msk.f32.mxu1 %vm2213_vm0, %v2212_v0  ;;  %v1668_v21 = vpop.permute.xlu1 %1667  ;;  %1981 = vmatpush3.msra.mxu1 %v1769_v56 }
 0xdc4   :  { %1894 = vmatmul.mubr.msk.f32.vlgmr.msra.gmra.mxu0 %vm883_vm4, %v1668_v21  ;;  %1982 = vmatprep.subr.mxu1 %v2212_v0 }
 0xdc5   :  { %1983 = vmatpush3.msra.mxu1 %v1768_v32 }
 0xdc6   :  { %1984 = vmatprep.subr.mxu1 %v2212_v0 }
 0xdc7   :  { %1985 = vmatpush3.msra.mxu1 %v1767_v34 }
 0xdc8   :  { %1986 = vmatprep.subr.mxu1 %v2212_v0 }
 0xdc9   :  { %1987 = vmatpush3.msra.mxu1 %v1766_v36 }
 0xe82   :  { %v1661_v25 = vpop.f32.mrf.mxu1 }
 0xe84   :  { %v1662_v29 = vpop.f32.mrf.mxu1  ;;  %v1737_v33 = vpop.f32.mrf.mxu0 }
 0xe85   :  { %v1665_v31 = vadd.f32 %v1662_v29, %v865_v26 }
 0xe86   :  { %v1738_v35 = vpop.f32.mrf.mxu0 }
 0xe87   :  { %v1741_v40 = vadd.f32 %v1738_v35, %v1665_v31 }
 0xe89   :  { %2065 = vtanh.f32 %v1741_v40  ;;  %v1895_v46 = vmul.f32 -1.442695, %v1741_v40 }
 0xe8b   :  { %2067 = vpow2.f32 %v1895_v46 }
 0xe96   :  { %v2066_v42 = vpop.eup %2065 }
 0xe97   :  { %1751 = vrot.lane.b32.xlu0 %v2066_v42, %s2216_s20 }
 0xe98   :  { %v2068_v15 = vpop.eup %2067 }
 0xe99   :  { %v1745_v48 = vadd.f32 1.0, %v2068_v15 }
 0xe9b   :  { %2069 = vrcp.f32 %v1745_v48 }
 0xea8   :  { %v2070_v52 = vpop.eup %2069 }
 0xea9   :  { %v1749_v2 = vmul.f32 %v2070_v52, %v1583_v11 }
 0xf09   :  { %v1752_v38 = vpop.permute.xlu0 %1751 }
 0xf0a   :  { %v1754_v54 = vmul.f32 %v2070_v52, %v1752_v38 }
 0xf0c   :  { %1756 = vrot.lane.b32.xlu1 %v1754_v54, %s2217_s4 }
 0xf7e   :  { %v1757_v50 = vpop.permute.xlu1 %1756 }
 0xf7f   :  { %v1759_v44 = vadd.f32 %v1757_v50, %v1749_v2 }
 0xf81   :  { %2071 = vtanh.f32 %v1759_v44 }
 0xf8e   :  { %v2072_v39 = vpop.eup %2071 }
 0xf8f   :  { %1762 = vrot.lane.b32.xlu0 %v2072_v39, %s2216_s20 }
0x1001   :  { %v1763_v41 = vpop.permute.xlu0 %1762 }
0x1002   :  { %v1765_v43 = vmul.f32 %v2070_v52, %v1763_v41 }
0x1004   :  { %1778 = vrot.lane.b32.xlu1 %v1765_v43, %s2217_s4 }
0x1076   :  { %v1779_v45 = vpop.permute.xlu1 %1778 }
0x1077   :  { %1989 = vmatmul.mubr.msk.f32.vlgmr.msra.gmra.mxu1 %vm883_vm4, %v1779_v45 }
0x1137   :  { %v1848_v51 = vpop.f32.mrf.mxu1 }
0x1138   :  { %v1849_v53 = vadd.f32 %v1896_v49, %v1848_v51 }
0x1139   :  { %v1990_v0 = vpop.f32.mrf.mxu1 }
0x113a   :  { %1852 = vst [vmem:[#allocation11] sm:$0x3] %v1849_v53 }
0x113b   :  { %2184 = shalt.err (!%p2181_p1)
}
0x113c   :  { %1862 = dma.vmem_to_hbm [thread:$0]  %s1860_s24, 32, %s2602_s12, [#allocation4]  }
0x113d   :  { %2199 = dma.done.wait [#allocation4], 32  }
0x113e   :  { %2200 = vsyncadd [#allocation4], 4294967264 }
0x113f   :  { %1866 = vsyncpa [#allocation3], 1 }
0x1140   :  { %1867 = vsyncpa [#allocation6], 1 }
0x1141   :  { %1868 = vsyncpa [#allocation9], 1 }
0x1142   :  { %1869 = vsyncpa [#allocation4], 1 }

</bundles_post_ra>
